<compile_context>
chip_gen: v7x
topology: tpu7x:2x2x1
jax: 0.10.0
libtpu: 0.0.40
codegen_flags: <defaults>
</compile_context>

<pallas_src>
from itertools import combinations

import jax
import jax.numpy as jnp
import numpy as np
from jax import lax
from jax.experimental import pallas as pl
from jax.experimental.pallas import tpu as pltpu


def _round_up(x, m):
    return ((x + m - 1) // m) * m


def _lorentz_fm_kernel(idx_ref, table_ref, o_ref):
    """idx_ref: (F, tb) int32; table_ref: (D, Vp) f32 (resident); o_ref: (1, tb) f32."""
    table = table_ref[...]                                   # (D, Vp), loaded from VMEM
    embed_dim, vocab = table.shape
    num_fields, tb = idx_ref.shape

    # One-hot comparison grid, hoisted out of the field loop.
    iota_v = lax.broadcasted_iota(jnp.int32, (vocab, tb), 0)

    sum_a = jnp.zeros((1, tb), jnp.float32)
    sum_a2 = jnp.zeros((1, tb), jnp.float32)
    sum_y2 = jnp.zeros((1, tb), jnp.float32)
    y_sum = jnp.zeros((embed_dim, tb), jnp.float32)

    # Static unroll over fields (F is small: 8-40).
    for f in range(num_fields):
        idx_f = idx_ref[pl.ds(f, 1), :]                      # (1, tb) int32
        onehot = jnp.where(iota_v == idx_f, 1.0, 0.0)        # (Vp, tb) exact 0/1
        # Exact gather: x_f[d, b] == table[d, idx_f[b]]  (one-hot MXU matmul).
        x_f = jnp.dot(table, onehot, preferred_element_type=jnp.float32)  # (D, tb)

        sq_f = jnp.sum(x_f * x_f, axis=0, keepdims=True)     # (1, tb)  ||x_i||^2
        a_f = lax.rsqrt(sq_f + 1.0)                          # 1 / u0_i  (EUP)
        a2_f = a_f * a_f

        sum_a = sum_a + a_f
        sum_a2 = sum_a2 + a2_f
        sum_y2 = sum_y2 + a2_f * sq_f
        y_sum = y_sum + a_f * x_f                            # (D, tb)

    y_sum_sq = jnp.sum(y_sum * y_sum, axis=0, keepdims=True)  # (1, tb)
    num_pairs = 0.5 * num_fields * (num_fields - 1)
    s = (num_pairs
         + 0.5 * (sum_a * sum_a - sum_a2)
         - (num_fields - 1) * sum_a
         - 0.5 * (y_sum_sq - sum_y2))                         # (1, tb)

    o_ref[...] = pl.reciprocal(1.0 + jnp.exp(-s)).astype(o_ref.dtype)


def lorentz_fm_forward(x_idx, table, field_dims, *, block_batch=1024):
    """x_idx: (B, F) per-field indices; table: (sum(field_dims), D) f32 -> (B, 1) scores."""
    batch, num_fields = x_idx.shape
    vocab, embed_dim = table.shape

    # FeaturesEmbedding offsets (shared table, per-field offset).
    offsets = np.concatenate(([0], np.cumsum(field_dims)[:-1])).astype(np.int32)
    idx_t = (x_idx.astype(jnp.int32) + jnp.asarray(offsets)[None, :]).T   # (F, B), lane-dense

    # Lane-dense batch tile, multiple of 128; pad only the tiny int32 indices.
    tb = min(_round_up(block_batch, 128), _round_up(batch, 128))
    b_pad = _round_up(batch, tb)
    if b_pad != batch:
        idx_t = jnp.pad(idx_t, ((0, 0), (0, b_pad - batch)))

    # Transposed table (D, vocab), padded to a lane multiple; stays VMEM-resident.
    v_pad = _round_up(vocab, 128)
    table_t = table.astype(jnp.float32).T
    if v_pad != vocab:
        table_t = jnp.pad(table_t, ((0, 0), (0, v_pad - vocab)))

    out = pl.pallas_call(
        _lorentz_fm_kernel,
        out_shape=jax.ShapeDtypeStruct((1, b_pad), jnp.float32),
        grid=(b_pad // tb,),
        in_specs=[
            pl.BlockSpec((num_fields, tb), lambda b: (0, b)),       # indices, tiled over batch
            pl.BlockSpec((embed_dim, v_pad), lambda b: (0, 0)),     # table, constant -> resident
        ],
        out_specs=pl.BlockSpec((1, tb), lambda b: (0, b)),          # lane-dense output slab
        compiler_params=pltpu.CompilerParams(
            dimension_semantics=("parallel",),                      # batch grid splits across TCs
            vmem_limit_bytes=32 * 1024 * 1024,
        ),
    )(idx_t, table_t)
    return out[0, :batch].reshape(batch, 1)


# ---------------- pure-JAX reference (mirrors the PyTorch module) ----------------

def features_embedding(x_idx, table, field_dims):
    offsets = np.concatenate(([0], np.cumsum(field_dims)[:-1])).astype(np.int32)
    return jnp.take(table, x_idx + jnp.asarray(offsets)[None, :], axis=0)


def lorentz_fm_reference(embed_x):
    x = embed_x.astype(jnp.float32)
    num_fields = x.shape[1]
    rows, cols = zip(*combinations(range(num_fields), 2))
    rows, cols = np.asarray(rows), np.asarray(cols)
    inner_product = jnp.sum(x[:, rows] * x[:, cols], axis=-1)        # (B, P)
    u0 = jnp.sqrt(jnp.sum(x * x, axis=-1) + 1.0)                     # (B, F)
    u, v = u0[:, rows], u0[:, cols]
    score = 1.0 + (1.0 - inner_product - u - v) / (u * v)
    return jax.nn.sigmoid(jnp.sum(score, axis=1, keepdims=True))


if __name__ == "__main__":
    key = jax.random.PRNGKey(0)
    field_dims = (11, 7, 5, 9, 13, 3, 17, 6)   # 8 fields, total vocab = 71
    embed_dim = 16
    batch = 256

    k_table, k_idx = jax.random.split(key)
    table = 0.1 * jax.random.normal(k_table, (sum(field_dims), embed_dim), jnp.float32)
    u = jax.random.uniform(k_idx, (batch, len(field_dims)))
    x_idx = jnp.minimum(
        jnp.floor(u * jnp.asarray(field_dims, jnp.float32)).astype(jnp.int32),
        jnp.asarray(field_dims, jnp.int32) - 1,
    )

    out = lorentz_fm_forward(x_idx, table, field_dims)
    out = jax.block_until_ready(out)
    assert out.shape == (batch, 1)

    ref = lorentz_fm_reference(features_embedding(x_idx, table, field_dims))
    np.testing.assert_allclose(np.asarray(out), np.asarray(ref), rtol=1e-4, atol=1e-4)

    print("KERNEL_OK")
</pallas_src>

<mosaic_0001>
module attributes {stable_mosaic.version = 11 : i64} {
  func.func @_lorentz_fm_kernel(%arg0: i32, %arg1: memref<8x256xi32, #tpu.memory_space<vmem>>, %arg2: memref<16x128xf32, #tpu.memory_space<vmem>>, %arg3: memref<1x256xf32, #tpu.memory_space<vmem>>) attributes {dimension_semantics = [#tpu.dimension_semantics<parallel>], iteration_bounds = array<i64: 1>, scalar_prefetch = 0 : i64, scratch_operands = 0 : i64, tpu.core_type = #tpu.core_type<tc>, window_params = [{transform_indices = @transform_0, window_bounds = array<i64: 8, 256>}, {pipeline_mode = #tpu.pipeline_mode<synchronous>, transform_indices = @transform_1, window_bounds = array<i64: 16, 128>}, {transform_indices = @transform_2, window_bounds = array<i64: 1, 256>}]} {
    %c0 = arith.constant 0 : index
    %c0_0 = arith.constant 0 : index
    %0 = vector.load %arg2[%c0, %c0_0] : memref<16x128xf32, #tpu.memory_space<vmem>>, vector<16x128xf32>
    %1 = tpu.iota {dimensions = array<i32: 0>} : vector<128x256xi32>
    %cst = arith.constant 0.000000e+00 : f32
    %2 = vector.broadcast %cst : f32 to vector<1x256xf32>
    %cst_1 = arith.constant 0.000000e+00 : f32
    %3 = vector.broadcast %cst_1 : f32 to vector<1x256xf32>
    %cst_2 = arith.constant 0.000000e+00 : f32
    %4 = vector.broadcast %cst_2 : f32 to vector<1x256xf32>
    %cst_3 = arith.constant 0.000000e+00 : f32
    %5 = vector.broadcast %cst_3 : f32 to vector<16x256xf32>
    %c0_4 = arith.constant 0 : index
    %c0_5 = arith.constant 0 : index
    %6 = vector.load %arg1[%c0_4, %c0_5] : memref<8x256xi32, #tpu.memory_space<vmem>>, vector<1x256xi32>
    %7 = vector.broadcast %6 : vector<1x256xi32> to vector<128x256xi32>
    %8 = arith.cmpi eq, %1, %7 : vector<128x256xi32>
    %cst_6 = arith.constant 1.000000e+00 : f32
    %cst_7 = arith.constant 0.000000e+00 : f32
    %9 = vector.broadcast %cst_6 : f32 to vector<128x256xf32>
    %10 = vector.broadcast %cst_7 : f32 to vector<128x256xf32>
    %11 = arith.select %8, %9, %10 : vector<128x256xi1>, vector<128x256xf32>
    %cst_8 = arith.constant dense<0.000000e+00> : vector<16x256xf32>
    %12 = tpu.matmul %0, %11, %cst_8 {dimension_numbers = #tpu.dot_dimension_numbers<[1], [0], [0], [1], [0, 0, 1, 1], [], []>} : vector<16x128xf32>, vector<128x256xf32>, vector<16x256xf32> -> vector<16x256xf32>
    %13 = arith.mulf %12, %12 : vector<16x256xf32>
    %cst_9 = arith.constant dense<0.000000e+00> : vector<256xf32>
    %14 = vector.multi_reduction <add>, %13, %cst_9 [0] : vector<16x256xf32> to vector<256xf32>
    %15 = vector.shape_cast %14 : vector<256xf32> to vector<1x256xf32>
    %cst_10 = arith.constant 1.000000e+00 : f32
    %16 = vector.broadcast %cst_10 : f32 to vector<1x256xf32>
    %17 = arith.addf %15, %16 : vector<1x256xf32>
    %18 = math.rsqrt %17 : vector<1x256xf32>
    %19 = arith.mulf %18, %18 : vector<1x256xf32>
    %20 = arith.addf %2, %18 : vector<1x256xf32>
    %21 = arith.addf %3, %19 : vector<1x256xf32>
    %22 = arith.mulf %19, %15 : vector<1x256xf32>
    %23 = arith.addf %4, %22 : vector<1x256xf32>
    %24 = vector.broadcast %18 : vector<1x256xf32> to vector<16x256xf32>
    %25 = arith.mulf %24, %12 : vector<16x256xf32>
    %26 = arith.addf %5, %25 : vector<16x256xf32>
    %c1 = arith.constant 1 : index
    %c0_11 = arith.constant 0 : index
    %27 = vector.load %arg1[%c1, %c0_11] : memref<8x256xi32, #tpu.memory_space<vmem>>, vector<1x256xi32>
    %28 = vector.broadcast %27 : vector<1x256xi32> to vector<128x256xi32>
    %29 = arith.cmpi eq, %1, %28 : vector<128x256xi32>
    %cst_12 = arith.constant 1.000000e+00 : f32
    %cst_13 = arith.constant 0.000000e+00 : f32
    %30 = vector.broadcast %cst_12 : f32 to vector<128x256xf32>
    %31 = vector.broadcast %cst_13 : f32 to vector<128x256xf32>
    %32 = arith.select %29, %30, %31 : vector<128x256xi1>, vector<128x256xf32>
    %cst_14 = arith.constant dense<0.000000e+00> : vector<16x256xf32>
    %33 = tpu.matmul %0, %32, %cst_14 {dimension_numbers = #tpu.dot_dimension_numbers<[1], [0], [0], [1], [0, 0, 1, 1], [], []>} : vector<16x128xf32>, vector<128x256xf32>, vector<16x256xf32> -> vector<16x256xf32>
    %34 = arith.mulf %33, %33 : vector<16x256xf32>
    %cst_15 = arith.constant dense<0.000000e+00> : vector<256xf32>
    %35 = vector.multi_reduction <add>, %34, %cst_15 [0] : vector<16x256xf32> to vector<256xf32>
    %36 = vector.shape_cast %35 : vector<256xf32> to vector<1x256xf32>
    %cst_16 = arith.constant 1.000000e+00 : f32
    %37 = vector.broadcast %cst_16 : f32 to vector<1x256xf32>
    %38 = arith.addf %36, %37 : vector<1x256xf32>
    %39 = math.rsqrt %38 : vector<1x256xf32>
    %40 = arith.mulf %39, %39 : vector<1x256xf32>
    %41 = arith.addf %20, %39 : vector<1x256xf32>
    %42 = arith.addf %21, %40 : vector<1x256xf32>
    %43 = arith.mulf %40, %36 : vector<1x256xf32>
    %44 = arith.addf %23, %43 : vector<1x256xf32>
    %45 = vector.broadcast %39 : vector<1x256xf32> to vector<16x256xf32>
    %46 = arith.mulf %45, %33 : vector<16x256xf32>
    %47 = arith.addf %26, %46 : vector<16x256xf32>
    %c2 = arith.constant 2 : index
    %c0_17 = arith.constant 0 : index
    %48 = vector.load %arg1[%c2, %c0_17] : memref<8x256xi32, #tpu.memory_space<vmem>>, vector<1x256xi32>
    %49 = vector.broadcast %48 : vector<1x256xi32> to vector<128x256xi32>
    %50 = arith.cmpi eq, %1, %49 : vector<128x256xi32>
    %cst_18 = arith.constant 1.000000e+00 : f32
    %cst_19 = arith.constant 0.000000e+00 : f32
    %51 = vector.broadcast %cst_18 : f32 to vector<128x256xf32>
    %52 = vector.broadcast %cst_19 : f32 to vector<128x256xf32>
    %53 = arith.select %50, %51, %52 : vector<128x256xi1>, vector<128x256xf32>
    %cst_20 = arith.constant dense<0.000000e+00> : vector<16x256xf32>
    %54 = tpu.matmul %0, %53, %cst_20 {dimension_numbers = #tpu.dot_dimension_numbers<[1], [0], [0], [1], [0, 0, 1, 1], [], []>} : vector<16x128xf32>, vector<128x256xf32>, vector<16x256xf32> -> vector<16x256xf32>
    %55 = arith.mulf %54, %54 : vector<16x256xf32>
    %cst_21 = arith.constant dense<0.000000e+00> : vector<256xf32>
    %56 = vector.multi_reduction <add>, %55, %cst_21 [0] : vector<16x256xf32> to vector<256xf32>
    %57 = vector.shape_cast %56 : vector<256xf32> to vector<1x256xf32>
    %cst_22 = arith.constant 1.000000e+00 : f32
    %58 = vector.broadcast %cst_22 : f32 to vector<1x256xf32>
    %59 = arith.addf %57, %58 : vector<1x256xf32>
    %60 = math.rsqrt %59 : vector<1x256xf32>
    %61 = arith.mulf %60, %60 : vector<1x256xf32>
    %62 = arith.addf %41, %60 : vector<1x256xf32>
    %63 = arith.addf %42, %61 : vector<1x256xf32>
    %64 = arith.mulf %61, %57 : vector<1x256xf32>
    %65 = arith.addf %44, %64 : vector<1x256xf32>
    %66 = vector.broadcast %60 : vector<1x256xf32> to vector<16x256xf32>
    %67 = arith.mulf %66, %54 : vector<16x256xf32>
    %68 = arith.addf %47, %67 : vector<16x256xf32>
    %c3 = arith.constant 3 : index
    %c0_23 = arith.constant 0 : index
    %69 = vector.load %arg1[%c3, %c0_23] : memref<8x256xi32, #tpu.memory_space<vmem>>, vector<1x256xi32>
    %70 = vector.broadcast %69 : vector<1x256xi32> to vector<128x256xi32>
    %71 = arith.cmpi eq, %1, %70 : vector<128x256xi32>
    %cst_24 = arith.constant 1.000000e+00 : f32
    %cst_25 = arith.constant 0.000000e+00 : f32
    %72 = vector.broadcast %cst_24 : f32 to vector<128x256xf32>
    %73 = vector.broadcast %cst_25 : f32 to vector<128x256xf32>
    %74 = arith.select %71, %72, %73 : vector<128x256xi1>, vector<128x256xf32>
    %cst_26 = arith.constant dense<0.000000e+00> : vector<16x256xf32>
    %75 = tpu.matmul %0, %74, %cst_26 {dimension_numbers = #tpu.dot_dimension_numbers<[1], [0], [0], [1], [0, 0, 1, 1], [], []>} : vector<16x128xf32>, vector<128x256xf32>, vector<16x256xf32> -> vector<16x256xf32>
    %76 = arith.mulf %75, %75 : vector<16x256xf32>
    %cst_27 = arith.constant dense<0.000000e+00> : vector<256xf32>
    %77 = vector.multi_reduction <add>, %76, %cst_27 [0] : vector<16x256xf32> to vector<256xf32>
    %78 = vector.shape_cast %77 : vector<256xf32> to vector<1x256xf32>
    %cst_28 = arith.constant 1.000000e+00 : f32
    %79 = vector.broadcast %cst_28 : f32 to vector<1x256xf32>
    %80 = arith.addf %78, %79 : vector<1x256xf32>
    %81 = math.rsqrt %80 : vector<1x256xf32>
    %82 = arith.mulf %81, %81 : vector<1x256xf32>
    %83 = arith.addf %62, %81 : vector<1x256xf32>
    %84 = arith.addf %63, %82 : vector<1x256xf32>
    %85 = arith.mulf %82, %78 : vector<1x256xf32>
    %86 = arith.addf %65, %85 : vector<1x256xf32>
    %87 = vector.broadcast %81 : vector<1x256xf32> to vector<16x256xf32>
    %88 = arith.mulf %87, %75 : vector<16x256xf32>
    %89 = arith.addf %68, %88 : vector<16x256xf32>
    %c4 = arith.constant 4 : index
    %c0_29 = arith.constant 0 : index
    %90 = vector.load %arg1[%c4, %c0_29] : memref<8x256xi32, #tpu.memory_space<vmem>>, vector<1x256xi32>
    %91 = vector.broadcast %90 : vector<1x256xi32> to vector<128x256xi32>
    %92 = arith.cmpi eq, %1, %91 : vector<128x256xi32>
    %cst_30 = arith.constant 1.000000e+00 : f32
    %cst_31 = arith.constant 0.000000e+00 : f32
    %93 = vector.broadcast %cst_30 : f32 to vector<128x256xf32>
    %94 = vector.broadcast %cst_31 : f32 to vector<128x256xf32>
    %95 = arith.select %92, %93, %94 : vector<128x256xi1>, vector<128x256xf32>
    %cst_32 = arith.constant dense<0.000000e+00> : vector<16x256xf32>
    %96 = tpu.matmul %0, %95, %cst_32 {dimension_numbers = #tpu.dot_dimension_numbers<[1], [0], [0], [1], [0, 0, 1, 1], [], []>} : vector<16x128xf32>, vector<128x256xf32>, vector<16x256xf32> -> vector<16x256xf32>
    %97 = arith.mulf %96, %96 : vector<16x256xf32>
    %cst_33 = arith.constant dense<0.000000e+00> : vector<256xf32>
    %98 = vector.multi_reduction <add>, %97, %cst_33 [0] : vector<16x256xf32> to vector<256xf32>
    %99 = vector.shape_cast %98 : vector<256xf32> to vector<1x256xf32>
    %cst_34 = arith.constant 1.000000e+00 : f32
    %100 = vector.broadcast %cst_34 : f32 to vector<1x256xf32>
    %101 = arith.addf %99, %100 : vector<1x256xf32>
    %102 = math.rsqrt %101 : vector<1x256xf32>
    %103 = arith.mulf %102, %102 : vector<1x256xf32>
    %104 = arith.addf %83, %102 : vector<1x256xf32>
    %105 = arith.addf %84, %103 : vector<1x256xf32>
    %106 = arith.mulf %103, %99 : vector<1x256xf32>
    %107 = arith.addf %86, %106 : vector<1x256xf32>
    %108 = vector.broadcast %102 : vector<1x256xf32> to vector<16x256xf32>
    %109 = arith.mulf %108, %96 : vector<16x256xf32>
    %110 = arith.addf %89, %109 : vector<16x256xf32>
    %c5 = arith.constant 5 : index
    %c0_35 = arith.constant 0 : index
    %111 = vector.load %arg1[%c5, %c0_35] : memref<8x256xi32, #tpu.memory_space<vmem>>, vector<1x256xi32>
    %112 = vector.broadcast %111 : vector<1x256xi32> to vector<128x256xi32>
    %113 = arith.cmpi eq, %1, %112 : vector<128x256xi32>
    %cst_36 = arith.constant 1.000000e+00 : f32
    %cst_37 = arith.constant 0.000000e+00 : f32
    %114 = vector.broadcast %cst_36 : f32 to vector<128x256xf32>
    %115 = vector.broadcast %cst_37 : f32 to vector<128x256xf32>
    %116 = arith.select %113, %114, %115 : vector<128x256xi1>, vector<128x256xf32>
    %cst_38 = arith.constant dense<0.000000e+00> : vector<16x256xf32>
    %117 = tpu.matmul %0, %116, %cst_38 {dimension_numbers = #tpu.dot_dimension_numbers<[1], [0], [0], [1], [0, 0, 1, 1], [], []>} : vector<16x128xf32>, vector<128x256xf32>, vector<16x256xf32> -> vector<16x256xf32>
    %118 = arith.mulf %117, %117 : vector<16x256xf32>
    %cst_39 = arith.constant dense<0.000000e+00> : vector<256xf32>
    %119 = vector.multi_reduction <add>, %118, %cst_39 [0] : vector<16x256xf32> to vector<256xf32>
    %120 = vector.shape_cast %119 : vector<256xf32> to vector<1x256xf32>
    %cst_40 = arith.constant 1.000000e+00 : f32
    %121 = vector.broadcast %cst_40 : f32 to vector<1x256xf32>
    %122 = arith.addf %120, %121 : vector<1x256xf32>
    %123 = math.rsqrt %122 : vector<1x256xf32>
    %124 = arith.mulf %123, %123 : vector<1x256xf32>
    %125 = arith.addf %104, %123 : vector<1x256xf32>
    %126 = arith.addf %105, %124 : vector<1x256xf32>
    %127 = arith.mulf %124, %120 : vector<1x256xf32>
    %128 = arith.addf %107, %127 : vector<1x256xf32>
    %129 = vector.broadcast %123 : vector<1x256xf32> to vector<16x256xf32>
    %130 = arith.mulf %129, %117 : vector<16x256xf32>
    %131 = arith.addf %110, %130 : vector<16x256xf32>
    %c6 = arith.constant 6 : index
    %c0_41 = arith.constant 0 : index
    %132 = vector.load %arg1[%c6, %c0_41] : memref<8x256xi32, #tpu.memory_space<vmem>>, vector<1x256xi32>
    %133 = vector.broadcast %132 : vector<1x256xi32> to vector<128x256xi32>
    %134 = arith.cmpi eq, %1, %133 : vector<128x256xi32>
    %cst_42 = arith.constant 1.000000e+00 : f32
    %cst_43 = arith.constant 0.000000e+00 : f32
    %135 = vector.broadcast %cst_42 : f32 to vector<128x256xf32>
    %136 = vector.broadcast %cst_43 : f32 to vector<128x256xf32>
    %137 = arith.select %134, %135, %136 : vector<128x256xi1>, vector<128x256xf32>
    %cst_44 = arith.constant dense<0.000000e+00> : vector<16x256xf32>
    %138 = tpu.matmul %0, %137, %cst_44 {dimension_numbers = #tpu.dot_dimension_numbers<[1], [0], [0], [1], [0, 0, 1, 1], [], []>} : vector<16x128xf32>, vector<128x256xf32>, vector<16x256xf32> -> vector<16x256xf32>
    %139 = arith.mulf %138, %138 : vector<16x256xf32>
    %cst_45 = arith.constant dense<0.000000e+00> : vector<256xf32>
    %140 = vector.multi_reduction <add>, %139, %cst_45 [0] : vector<16x256xf32> to vector<256xf32>
    %141 = vector.shape_cast %140 : vector<256xf32> to vector<1x256xf32>
    %cst_46 = arith.constant 1.000000e+00 : f32
    %142 = vector.broadcast %cst_46 : f32 to vector<1x256xf32>
    %143 = arith.addf %141, %142 : vector<1x256xf32>
    %144 = math.rsqrt %143 : vector<1x256xf32>
    %145 = arith.mulf %144, %144 : vector<1x256xf32>
    %146 = arith.addf %125, %144 : vector<1x256xf32>
    %147 = arith.addf %126, %145 : vector<1x256xf32>
    %148 = arith.mulf %145, %141 : vector<1x256xf32>
    %149 = arith.addf %128, %148 : vector<1x256xf32>
    %150 = vector.broadcast %144 : vector<1x256xf32> to vector<16x256xf32>
    %151 = arith.mulf %150, %138 : vector<16x256xf32>
    %152 = arith.addf %131, %151 : vector<16x256xf32>
    %c7 = arith.constant 7 : index
    %c0_47 = arith.constant 0 : index
    %153 = vector.load %arg1[%c7, %c0_47] : memref<8x256xi32, #tpu.memory_space<vmem>>, vector<1x256xi32>
    %154 = vector.broadcast %153 : vector<1x256xi32> to vector<128x256xi32>
    %155 = arith.cmpi eq, %1, %154 : vector<128x256xi32>
    %cst_48 = arith.constant 1.000000e+00 : f32
    %cst_49 = arith.constant 0.000000e+00 : f32
    %156 = vector.broadcast %cst_48 : f32 to vector<128x256xf32>
    %157 = vector.broadcast %cst_49 : f32 to vector<128x256xf32>
    %158 = arith.select %155, %156, %157 : vector<128x256xi1>, vector<128x256xf32>
    %cst_50 = arith.constant dense<0.000000e+00> : vector<16x256xf32>
    %159 = tpu.matmul %0, %158, %cst_50 {dimension_numbers = #tpu.dot_dimension_numbers<[1], [0], [0], [1], [0, 0, 1, 1], [], []>} : vector<16x128xf32>, vector<128x256xf32>, vector<16x256xf32> -> vector<16x256xf32>
    %160 = arith.mulf %159, %159 : vector<16x256xf32>
    %cst_51 = arith.constant dense<0.000000e+00> : vector<256xf32>
    %161 = vector.multi_reduction <add>, %160, %cst_51 [0] : vector<16x256xf32> to vector<256xf32>
    %162 = vector.shape_cast %161 : vector<256xf32> to vector<1x256xf32>
    %cst_52 = arith.constant 1.000000e+00 : f32
    %163 = vector.broadcast %cst_52 : f32 to vector<1x256xf32>
    %164 = arith.addf %162, %163 : vector<1x256xf32>
    %165 = math.rsqrt %164 : vector<1x256xf32>
    %166 = arith.mulf %165, %165 : vector<1x256xf32>
    %167 = arith.addf %146, %165 : vector<1x256xf32>
    %168 = arith.addf %147, %166 : vector<1x256xf32>
    %169 = arith.mulf %166, %162 : vector<1x256xf32>
    %170 = arith.addf %149, %169 : vector<1x256xf32>
    %171 = vector.broadcast %165 : vector<1x256xf32> to vector<16x256xf32>
    %172 = arith.mulf %171, %159 : vector<16x256xf32>
    %173 = arith.addf %152, %172 : vector<16x256xf32>
    %174 = arith.mulf %173, %173 : vector<16x256xf32>
    %cst_53 = arith.constant dense<0.000000e+00> : vector<256xf32>
    %175 = vector.multi_reduction <add>, %174, %cst_53 [0] : vector<16x256xf32> to vector<256xf32>
    %176 = vector.shape_cast %175 : vector<256xf32> to vector<1x256xf32>
    %177 = arith.mulf %167, %167 : vector<1x256xf32>
    %178 = arith.subf %177, %168 : vector<1x256xf32>
    %cst_54 = arith.constant 5.000000e-01 : f32
    %179 = vector.broadcast %cst_54 : f32 to vector<1x256xf32>
    %180 = arith.mulf %179, %178 : vector<1x256xf32>
    %cst_55 = arith.constant 2.800000e+01 : f32
    %181 = vector.broadcast %cst_55 : f32 to vector<1x256xf32>
    %182 = arith.addf %181, %180 : vector<1x256xf32>
    %cst_56 = arith.constant 7.000000e+00 : f32
    %183 = vector.broadcast %cst_56 : f32 to vector<1x256xf32>
    %184 = arith.mulf %183, %167 : vector<1x256xf32>
    %185 = arith.subf %182, %184 : vector<1x256xf32>
    %186 = arith.subf %176, %170 : vector<1x256xf32>
    %cst_57 = arith.constant 5.000000e-01 : f32
    %187 = vector.broadcast %cst_57 : f32 to vector<1x256xf32>
    %188 = arith.mulf %187, %186 : vector<1x256xf32>
    %189 = arith.subf %185, %188 : vector<1x256xf32>
    %cst_58 = arith.constant 0.000000e+00 : f32
    %190 = vector.broadcast %cst_58 : f32 to vector<1x256xf32>
    %191 = arith.subf %190, %189 : vector<1x256xf32>
    %192 = math.exp %191 : vector<1x256xf32>
    %cst_59 = arith.constant 1.000000e+00 : f32
    %193 = vector.broadcast %cst_59 : f32 to vector<1x256xf32>
    %194 = arith.addf %193, %192 : vector<1x256xf32>
    %195 = tpu.reciprocal %194 : vector<1x256xf32> -> vector<1x256xf32>
    %c0_60 = arith.constant 0 : index
    %c0_61 = arith.constant 0 : index
    %196 = vector.load %arg3[%c0_60, %c0_61] : memref<1x256xf32, #tpu.memory_space<vmem>>, vector<1x256xf32>
    tpu.vector_store %arg3[%c0_60, %c0_61], %195 {strides = array<i32>} : memref<1x256xf32, #tpu.memory_space<vmem>>, vector<1x256xf32>,
    return
  }
  func.func @transform_0(%arg0: i32) -> (i32, i32) {
    %c0_i32 = arith.constant 0 : i32
    %c0_i32_0 = arith.constant 0 : i32
    return %c0_i32, %arg0 : i32, i32
  }
  func.func @transform_1(%arg0: i32) -> (i32, i32) {
    %c0_i32 = arith.constant 0 : i32
    %c0_i32_0 = arith.constant 0 : i32
    %c0_i32_1 = arith.constant 0 : i32
    return %c0_i32, %c0_i32_0 : i32, i32
  }
  func.func @transform_2(%arg0: i32) -> (i32, i32) {
    %c0_i32 = arith.constant 0 : i32
    %c0_i32_0 = arith.constant 0 : i32
    return %c0_i32, %arg0 : i32, i32
  }
}

</mosaic_0001>

<bundles_post_ra>
// kernel: tpu_custom_call.1
= control target key start
LH: loop header
LB: loop body
LE: loop exit
PB: predicated region body
PF: predicated region fallthrough
CT: control target
= control target key end

     0   :  { %7 = vsyncpa [#allocation3], 0  ;;  %s3995_s0 = inlined_call_operand.hbm [shape: s32[8,256], index: 0, kind: input, shape index: {}]   ;;  %s3996_s1 = inlined_call_operand.hbm [shape: f32[16,128], index: 1, kind: input, shape index: {}]   ;;  %s3997_s2 = inlined_call_operand.hbm [shape: f32[1,256], index: 2, kind: output, shape index: {}]  }
   0x1   :  { %8 = vsyncpa [#allocation6], 0 }
   0x2   :  { %9 = vsyncpa [#allocation4], 0  ;;  %s2301_s9 = smov [#allocation2]   ;;  %s2302_s11 = smov [#allocation5]  }
   0x3   :  { %s16_s10 = sshll.u32 %s2301_s9, 4  ;;  %s25_s12 = sshll.u32 %s2302_s11, 4  ;;  %s17_s10 = int_to_ptr.vmem [resolvable:$true] %s16_s10  ;;  %s2324_s12 = int_to_ptr.vmem [resolvable:$true] %s25_s12 }
   0x4   :  { %s2229_s15 = scalar_lea.hbm %s3995_s0, 256 }
   0x5   :  { %p2230_p0 = scmp.ne.s32.totalorder %s3995_s0, %s2229_s15  ;;  %p2233_p1 = scmp.lt.u32.totalorder %s2229_s15, %s3995_s0 }
   0x7   :  { %p2235_p2 = pnand %p2233_p1, %p2230_p0 }
   0x9   :  { %2238 = shalt.err (!%p2235_p2)
}
   0xa   :  { %s2239_s20 = scalar_lea.vmem %s17_s10, 256  ;;  %p2244_p4 = scmp.lt.s32.totalorder %s17_s10, %s17_s10 }
   0xb   :  { %p2240_p3 = scmp.ne.s32.totalorder %s17_s10, %s2239_s20  ;;  %p2245_p5 = scmp.lt.s32.totalorder %s2239_s20, %s2239_s20 }
   0xd   :  { %p2246_p6 = por %p2245_p5, %p2244_p4 }
   0xf   :  { %p2247_p7 = pnand %p2246_p6, %p2240_p3 }
  0x11   :  { %2250 = shalt.err (!%p2247_p7)
}
  0x12   :  { %19 = dma.hbm_to_vmem [thread:$0]  %s3995_s0, 256, %s17_s10, [#allocation3]  }
  0x13   :  { %s2251_s25 = scalar_lea.hbm %s3996_s1, 256 }
  0x14   :  { %p2252_p8 = scmp.ne.s32.totalorder %s3996_s1, %s2251_s25  ;;  %p2255_p9 = scmp.lt.u32.totalorder %s2251_s25, %s3996_s1 }
  0x16   :  { %p2257_p10 = pnand %p2255_p9, %p2252_p8 }
  0x18   :  { %2260 = shalt.err (!%p2257_p10)
}
  0x19   :  { %s2261_s30 = scalar_lea.vmem %s2324_s12, 256  ;;  %p2266_p12 = scmp.lt.s32.totalorder %s2324_s12, %s2324_s12 }
  0x1a   :  { %p2262_p11 = scmp.ne.s32.totalorder %s2324_s12, %s2261_s30  ;;  %p2267_p13 = scmp.lt.s32.totalorder %s2261_s30, %s2261_s30 }
  0x1c   :  { %p2268_p0 = por %p2267_p13, %p2266_p12 }
  0x1e   :  { %p2269_p1 = pnand %p2268_p0, %p2262_p11 }
  0x20   :  { %2272 = shalt.err (!%p2269_p1)
}
  0x21   :  { %s2303_s0 = smov 128   ;;  %s2304_s3 = smov 8  }
  0x22   :  { %31 = dma.hbm_to_vmem [thread:$0]  %s3996_s1, 256, %s2324_s12, [#allocation6], %s2303_s0, %s2303_s0, %s2304_s3  }
  0x23   :  { %2295 = dma.done.wait [#allocation3], 256  }
  0x24   :  { %2296 = vsyncadd [#allocation3], 4294967040 }
  0x25   :  { %2297 = dma.done.wait [#allocation6], 256  }
  0x26   :  { %2298 = vsyncadd [#allocation6], 4294967040  ;;  %v40_v0 = vlaneseq  ;;  %v2305_v1 = vmov 0.0   ;;  %v57_v8 = vld [vmem:[#allocation2] ss:$8 sm:$0x3] }
  0x27   :  { %194 = vmatprep.mubr.f32.mxu0 %v2305_v1  ;;  %385 = vmatprep.mubr.f32.mxu1 %v2305_v1  ;;  %v248_v9 = vld [vmem:[#allocation2 + $0x1] ss:$8 sm:$0x3]  ;;  %v2306_v14 = vmov 1.0|1.0   ;;  %v2687_v35 = vld [vmem:[#allocation5] sm:$0xff] }
  0x28   :  { %v2358_v2 = vshrl.u32 %v40_v0, 7  ;;  %v439_v25 = vld [vmem:[#allocation2 + $0x2] ss:$8 sm:$0x3]  ;;  %v2758_v43 = vld [vmem:[#allocation5 + $0x8] sm:$0xff]  ;;  %s2308_s1 = smov [#allocation7]  }
  0x29   :  { %v630_v27 = vld [vmem:[#allocation2 + $0x3] ss:$8 sm:$0x3]  ;;  %v821_v33 = vld [vmem:[#allocation2 + $0x4] ss:$8 sm:$0x3] }
  0x2a   :  { %v2361_v3 = vsub.s32 1, %v2358_v2  ;;  %v2364_v4 = vsub.s32 0, %v2358_v2  ;;  %v2367_v5 = vadd.s32 8, %v2358_v2  ;;  %v2370_v6 = vadd.s32 16, %v2358_v2  ;;  %s1659_s6 = sshll.u32 %s2308_s1, 4  ;;  %s1660_s6 = int_to_ptr.vmem [resolvable:$true] %s1659_s6 }
  0x2b   :  { %v2373_v7 = vadd.s32 24, %v2358_v2  ;;  %v2409_v15 = vadd.s32 32, %v2358_v2  ;;  %v2412_v16 = vadd.s32 40, %v2358_v2  ;;  %v2435_v17 = vadd.s32 48, %v2358_v2  ;;  %s2273_s7 = scalar_lea.vmem %s1660_s6, 32  ;;  %p2278_p3 = scmp.lt.s32.totalorder %s1660_s6, %s1660_s6 }
  0x2c   :  { %v2376_v10 = vrot.slane %v57_v8, %v2361_v3  ;;  %v2379_v11 = vrot.slane %v248_v9, %v2361_v3  ;;  %v2382_v12 = vrot.slane %v57_v8, %v2364_v4  ;;  %v2385_v13 = vrot.slane %v248_v9, %v2364_v4  ;;  %v1012_v34 = vld [vmem:[#allocation2 + $0x5] ss:$8 sm:$0x3]  ;;  %v1203_v36 = vld [vmem:[#allocation2 + $0x6] ss:$8 sm:$0x3]  ;;  %p2274_p2 = scmp.ne.s32.totalorder %s1660_s6, %s2273_s7  ;;  %p2279_p4 = scmp.lt.s32.totalorder %s2273_s7, %s2273_s7 }
  0x2d   :  { %v2438_v18 = vadd.s32 56, %v2358_v2  ;;  %v2461_v19 = vadd.s32 64, %v2358_v2  ;;  %v2464_v20 = vadd.s32 72, %v2358_v2  ;;  %v2487_v21 = vadd.s32 80, %v2358_v2 }
  0x2e   :  { %vm67_vm0 = vcmp.eq.s32.totalorder %v2358_v2, %v2376_v10  ;;  %vm69_vm1 = vcmp.eq.s32.totalorder %v2367_v5, %v2376_v10  ;;  %vm258_vm2 = vcmp.eq.s32.totalorder %v2358_v2, %v2379_v11  ;;  %vm260_vm3 = vcmp.eq.s32.totalorder %v2367_v5, %v2379_v11  ;;  %v2731_v41 = vld [vmem:[#allocation2 + $0x7] ss:$8 sm:$0x3]  ;;  %p2280_p5 = por %p2279_p4, %p2278_p3 }
  0x2f   :  { %vm1925_vm4 = vmpackc.low %vm69_vm1, %vm67_vm0  ;;  %vm66_vm5 = vcmp.eq.s32.totalorder %v2358_v2, %v2382_v12  ;;  %vm68_vm6 = vcmp.eq.s32.totalorder %v2367_v5, %v2382_v12  ;;  %vm257_vm7 = vcmp.eq.s32.totalorder %v2358_v2, %v2385_v13  ;;  %vm259_vm8 = vcmp.eq.s32.totalorder %v2367_v5, %v2385_v13 }
  0x30   :  { %1926 = vmatprep.subr.msk.bf16.mxu0 %vm1925_vm4, %v2306_v14  ;;  %vm1957_vm9 = vmpackc.low %vm260_vm3, %vm258_vm2  ;;  %vm71_vm10 = vcmp.eq.s32.totalorder %v2370_v6, %v2376_v10  ;;  %vm73_vm11 = vcmp.eq.s32.totalorder %v2373_v7, %v2376_v10  ;;  %vm262_vm13 = vcmp.eq.s32.totalorder %v2370_v6, %v2379_v11  ;;  %vm264_vm14 = vcmp.eq.s32.totalorder %v2373_v7, %v2379_v11  ;;  %p2281_p6 = pnand %p2280_p5, %p2274_p2 }
  0x31   :  { %1958 = vmatprep.subr.msk.bf16.mxu1 %vm1957_vm9, %v2306_v14  ;;  %vm1927_vm12 = vmpackc.low %vm68_vm6, %vm66_vm5  ;;  %vm70_vm0 = vcmp.eq.s32.totalorder %v2370_v6, %v2382_v12  ;;  %vm72_vm1 = vcmp.eq.s32.totalorder %v2373_v7, %v2382_v12  ;;  %vm261_vm3 = vcmp.eq.s32.totalorder %v2370_v6, %v2385_v13  ;;  %vm263_vm4 = vcmp.eq.s32.totalorder %v2373_v7, %v2385_v13 }
  0x32   :  { %1928 = vmatpush1.bf16.msk.msra.mxu0 %vm1927_vm12, %v2306_v14  ;;  %vm1959_vm15 = vmpackc.low %vm259_vm8, %vm257_vm7  ;;  %vm75_vm6 = vcmp.eq.s32.totalorder %v2409_v15, %v2376_v10  ;;  %vm77_vm7 = vcmp.eq.s32.totalorder %v2412_v16, %v2376_v10  ;;  %vm266_vm9 = vcmp.eq.s32.totalorder %v2409_v15, %v2379_v11  ;;  %vm74_vm12 = vcmp.eq.s32.totalorder %v2409_v15, %v2382_v12 }
  0x33   :  { %1960 = vmatpush1.bf16.msk.msra.mxu1 %vm1959_vm15, %v2306_v14  ;;  %vm1929_vm2 = vmpackc.low %vm73_vm11, %vm71_vm10  ;;  %vm268_vm10 = vcmp.eq.s32.totalorder %v2412_v16, %v2379_v11  ;;  %vm265_vm15 = vcmp.eq.s32.totalorder %v2409_v15, %v2385_v13  ;;  %v2490_v22 = vadd.s32 88, %v2358_v2  ;;  %v2513_v23 = vadd.s32 96, %v2358_v2 }
  0x34   :  { %1930 = vmatprep.subr.msk.bf16.mxu0 %vm1929_vm2, %v2306_v14  ;;  %vm1961_vm5 = vmpackc.low %vm264_vm14, %vm262_vm13  ;;  %vm76_vm13 = vcmp.eq.s32.totalorder %v2412_v16, %v2382_v12  ;;  %vm79_vm2 = vcmp.eq.s32.totalorder %v2435_v17, %v2376_v10  ;;  %v2516_v24 = vadd.s32 104, %v2358_v2  ;;  %v2534_v26 = vadd.s32 112, %v2358_v2 }
  0x35   :  { %1962 = vmatprep.subr.msk.bf16.mxu1 %vm1961_vm5, %v2306_v14  ;;  %vm1931_vm8 = vmpackc.low %vm72_vm1, %vm70_vm0  ;;  %vm267_vm0 = vcmp.eq.s32.totalorder %v2412_v16, %v2385_v13  ;;  %vm270_vm5 = vcmp.eq.s32.totalorder %v2435_v17, %v2379_v11  ;;  %v2542_v28 = vadd.s32 120, %v2358_v2  ;;  %v2555_v29 = vrot.slane %v439_v25, %v2361_v3 }
  0x36   :  { %1932 = vmatpush1.bf16.msk.msra.mxu0 %vm1931_vm8, %v2306_v14  ;;  %vm1963_vm11 = vmpackc.low %vm263_vm4, %vm261_vm3  ;;  %vm81_vm3 = vcmp.eq.s32.totalorder %v2438_v18, %v2376_v10  ;;  %vm78_vm8 = vcmp.eq.s32.totalorder %v2435_v17, %v2382_v12  ;;  %v2569_v30 = vrot.slane %v439_v25, %v2364_v4  ;;  %v2572_v31 = vrot.slane %v630_v27, %v2364_v4 }
  0x37   :  { %1964 = vmatpush1.bf16.msk.msra.mxu1 %vm1963_vm11, %v2306_v14  ;;  %vm1933_vm14 = vmpackc.low %vm77_vm7, %vm75_vm6  ;;  %vm272_vm6 = vcmp.eq.s32.totalorder %v2438_v18, %v2379_v11  ;;  %vm269_vm11 = vcmp.eq.s32.totalorder %v2435_v17, %v2385_v13  ;;  %v2588_v32 = vrot.slane %v630_v27, %v2361_v3  ;;  %v2707_v37 = vrot.slane %v821_v33, %v2364_v4 }
  0x38   :  { %1934 = vmatprep.subr.msk.bf16.mxu0 %vm1933_vm14, %v2306_v14  ;;  %vm1965_vm1 = vmpackc.low %vm268_vm10, %vm266_vm9  ;;  %vm80_vm9 = vcmp.eq.s32.totalorder %v2438_v18, %v2382_v12  ;;  %vm83_vm14 = vcmp.eq.s32.totalorder %v2461_v19, %v2376_v10  ;;  %v2710_v38 = vrot.slane %v821_v33, %v2361_v3  ;;  %v2713_v39 = vrot.slane %v1012_v34, %v2364_v4 }
  0x39   :  { %1966 = vmatprep.subr.msk.bf16.mxu1 %vm1965_vm1, %v2306_v14  ;;  %vm1935_vm4 = vmpackc.low %vm76_vm13, %vm74_vm12  ;;  %vm271_vm12 = vcmp.eq.s32.totalorder %v2438_v18, %v2385_v13  ;;  %vm274_vm1 = vcmp.eq.s32.totalorder %v2461_v19, %v2379_v11  ;;  %v2729_v40 = vrot.slane %v1012_v34, %v2361_v3  ;;  %v2748_v42 = vrot.slane %v1203_v36, %v2364_v4 }
  0x3a   :  { %1936 = vmatpush1.bf16.msk.msra.mxu0 %vm1935_vm4, %v2306_v14  ;;  %vm1967_vm7 = vmpackc.low %vm267_vm0, %vm265_vm15  ;;  %vm85_vm15 = vcmp.eq.s32.totalorder %v2464_v20, %v2376_v10  ;;  %vm82_vm4 = vcmp.eq.s32.totalorder %v2461_v19, %v2382_v12  ;;  %v2769_v44 = vrot.slane %v1203_v36, %v2361_v3  ;;  %v2789_v45 = vrot.slane %v2731_v41, %v2364_v4 }
  0x3b   :  { %1968 = vmatpush1.bf16.msk.msra.mxu1 %vm1967_vm7, %v2306_v14  ;;  %vm1937_vm10 = vmpackc.low %vm81_vm3, %vm79_vm2  ;;  %vm276_vm2 = vcmp.eq.s32.totalorder %v2464_v20, %v2379_v11  ;;  %vm273_vm7 = vcmp.eq.s32.totalorder %v2461_v19, %v2385_v13  ;;  %v3086_v46 = vrot.slane %v2731_v41, %v2361_v3 }
  0x3c   :  { %1938 = vmatprep.subr.msk.bf16.mxu0 %vm1937_vm10, %v2306_v14  ;;  %vm1969_vm13 = vmpackc.low %vm272_vm6, %vm270_vm5  ;;  %vm84_vm5 = vcmp.eq.s32.totalorder %v2464_v20, %v2382_v12  ;;  %vm87_vm10 = vcmp.eq.s32.totalorder %v2487_v21, %v2376_v10 }
  0x3d   :  { %1970 = vmatprep.subr.msk.bf16.mxu1 %vm1969_vm13, %v2306_v14  ;;  %vm1939_vm0 = vmpackc.low %vm80_vm9, %vm78_vm8  ;;  %vm275_vm8 = vcmp.eq.s32.totalorder %v2464_v20, %v2385_v13  ;;  %vm278_vm13 = vcmp.eq.s32.totalorder %v2487_v21, %v2379_v11 }
  0x3e   :  { %1940 = vmatpush1.bf16.msk.msra.mxu0 %vm1939_vm0, %v2306_v14  ;;  %vm1971_vm3 = vmpackc.low %vm271_vm12, %vm269_vm11  ;;  %vm89_vm11 = vcmp.eq.s32.totalorder %v2490_v22, %v2376_v10  ;;  %vm86_vm0 = vcmp.eq.s32.totalorder %v2487_v21, %v2382_v12 }
  0x3f   :  { %1972 = vmatpush1.bf16.msk.msra.mxu1 %vm1971_vm3, %v2306_v14  ;;  %vm1941_vm6 = vmpackc.low %vm85_vm15, %vm83_vm14  ;;  %vm280_vm14 = vcmp.eq.s32.totalorder %v2490_v22, %v2379_v11  ;;  %vm277_vm3 = vcmp.eq.s32.totalorder %v2487_v21, %v2385_v13 }
  0x40   :  { %1942 = vmatprep.subr.msk.bf16.mxu0 %vm1941_vm6, %v2306_v14  ;;  %vm1973_vm9 = vmpackc.low %vm276_vm2, %vm274_vm1  ;;  %vm88_vm1 = vcmp.eq.s32.totalorder %v2490_v22, %v2382_v12  ;;  %vm91_vm6 = vcmp.eq.s32.totalorder %v2513_v23, %v2376_v10 }
  0x41   :  { %1974 = vmatprep.subr.msk.bf16.mxu1 %vm1973_vm9, %v2306_v14  ;;  %vm1943_vm12 = vmpackc.low %vm84_vm5, %vm82_vm4  ;;  %vm279_vm4 = vcmp.eq.s32.totalorder %v2490_v22, %v2385_v13  ;;  %vm282_vm9 = vcmp.eq.s32.totalorder %v2513_v23, %v2379_v11 }
  0x42   :  { %1944 = vmatpush1.bf16.msk.msra.mxu0 %vm1943_vm12, %v2306_v14  ;;  %vm1975_vm15 = vmpackc.low %vm275_vm8, %vm273_vm7  ;;  %vm93_vm7 = vcmp.eq.s32.totalorder %v2516_v24, %v2376_v10 }
  0x43   :  { %1976 = vmatpush1.bf16.msk.msra.mxu1 %vm1975_vm15, %v2306_v14  ;;  %vm1945_vm2 = vmpackc.low %vm89_vm11, %vm87_vm10  ;;  %vm284_vm10 = vcmp.eq.s32.totalorder %v2516_v24, %v2379_v11  ;;  %vm90_vm11 = vcmp.eq.s32.totalorder %v2513_v23, %v2382_v12 }
  0x44   :  { %1946 = vmatprep.subr.msk.bf16.mxu0 %vm1945_vm2, %v2306_v14  ;;  %vm1977_vm5 = vmpackc.low %vm280_vm14, %vm278_vm13  ;;  %vm92_vm13 = vcmp.eq.s32.totalorder %v2516_v24, %v2382_v12  ;;  %vm281_vm14 = vcmp.eq.s32.totalorder %v2513_v23, %v2385_v13  ;;  %vm286_vm2 = vcmp.eq.s32.totalorder %v2534_v26, %v2379_v11 }
  0x45   :  { %1978 = vmatprep.subr.msk.bf16.mxu1 %vm1977_vm5, %v2306_v14  ;;  %vm1947_vm8 = vmpackc.low %vm88_vm1, %vm86_vm0  ;;  %vm283_vm0 = vcmp.eq.s32.totalorder %v2516_v24, %v2385_v13  ;;  %vm95_vm1 = vcmp.eq.s32.totalorder %v2534_v26, %v2376_v10  ;;  %vm288_vm5 = vcmp.eq.s32.totalorder %v2542_v28, %v2379_v11 }
  0x46   :  { %1948 = vmatpush1.bf16.msk.msra.mxu0 %vm1947_vm8, %v2306_v14  ;;  %vm1979_vm12 = vmpackc.low %vm279_vm4, %vm277_vm3  ;;  %vm97_vm4 = vcmp.eq.s32.totalorder %v2542_v28, %v2376_v10 }
  0x47   :  { %1980 = vmatpush1.bf16.msk.msra.mxu1 %vm1979_vm12, %v2306_v14  ;;  %vm1949_vm15 = vmpackc.low %vm93_vm7, %vm91_vm6  ;;  %vm94_vm6 = vcmp.eq.s32.totalorder %v2534_v26, %v2382_v12  ;;  %vm285_vm7 = vcmp.eq.s32.totalorder %v2534_v26, %v2385_v13  ;;  %vm456_vm12 = vcmp.eq.s32.totalorder %v2409_v15, %v2569_v30 }
  0x48   :  { %1950 = vmatprep.subr.msk.bf16.mxu0 %vm1949_vm15, %v2306_v14  ;;  %vm1981_vm3 = vmpackc.low %vm284_vm10, %vm282_vm9  ;;  %vm96_vm9 = vcmp.eq.s32.totalorder %v2542_v28, %v2382_v12  ;;  %vm287_vm10 = vcmp.eq.s32.totalorder %v2542_v28, %v2385_v13 }
  0x49   :  { %1982 = vmatprep.subr.msk.bf16.mxu1 %vm1981_vm3, %v2306_v14  ;;  %vm1951_vm8 = vmpackc.low %vm92_vm13, %vm90_vm11  ;;  %vm448_vm13 = vcmp.eq.s32.totalorder %v2358_v2, %v2569_v30  ;;  %vm450_vm3 = vcmp.eq.s32.totalorder %v2367_v5, %v2569_v30 }
  0x4a   :  { %1952 = vmatpush1.bf16.msk.msra.mxu0 %vm1951_vm8, %v2306_v14  ;;  %vm1983_vm11 = vmpackc.low %vm283_vm0, %vm281_vm14  ;;  %vm640_vm0 = vcmp.eq.s32.totalorder %v2358_v2, %v2588_v32  ;;  %vm642_vm8 = vcmp.eq.s32.totalorder %v2367_v5, %v2588_v32 }
  0x4b   :  { %1984 = vmatpush1.bf16.msk.msra.mxu1 %vm1983_vm11, %v2306_v14  ;;  %vm1953_vm14 = vmpackc.low %vm97_vm4, %vm95_vm1  ;;  %vm644_vm4 = vcmp.eq.s32.totalorder %v2370_v6, %v2588_v32  ;;  %vm646_vm11 = vcmp.eq.s32.totalorder %v2373_v7, %v2588_v32 }
  0x4c   :  { %1954 = vmatprep.subr.msk.bf16.mxu0 %vm1953_vm14, %v2306_v14  ;;  %vm1985_vm1 = vmpackc.low %vm288_vm5, %vm286_vm2  ;;  %vm643_vm5 = vcmp.eq.s32.totalorder %v2370_v6, %v2572_v31  ;;  %vm645_vm14 = vcmp.eq.s32.totalorder %v2373_v7, %v2572_v31 }
  0x4d   :  { %1986 = vmatprep.subr.msk.bf16.mxu1 %vm1985_vm1, %v2306_v14  ;;  %vm1955_vm2 = vmpackc.low %vm96_vm9, %vm94_vm6  ;;  %vm650_vm1 = vcmp.eq.s32.totalorder %v2412_v16, %v2588_v32 }
  0x4e   :  { %1956 = vmatpush1.bf16.msk.msra.mxu0 %vm1955_vm2, %v2306_v14  ;;  %vm1987_vm6 = vmpackc.low %vm287_vm10, %vm285_vm7  ;;  %vm458_vm2 = vcmp.eq.s32.totalorder %v2412_v16, %v2569_v30  ;;  %vm3998_vm7 = vcmp.eq.s32.totalorder %v2358_v2, %v2555_v29  ;;  %vm3999_vm10 = vcmp.eq.s32.totalorder %v2367_v5, %v2555_v29 }
  0x4f   :  { %1988 = vmatpush1.bf16.msk.msra.mxu1 %vm1987_vm6, %v2306_v14  ;;  %vm1989_vm15 = vmpackc.low %vm3999_vm10, %vm3998_vm7  ;;  %vm649_vm7 = vcmp.eq.s32.totalorder %v2412_v16, %v2572_v31  ;;  %vm461_vm10 = vcmp.eq.s32.totalorder %v2435_v17, %v2555_v29 }
  0x50   :  { %1990 = vmatprep.subr.msk.bf16.mxu0 %vm1989_vm15, %v2306_v14  ;;  %vm2021_vm6 = vmpackc.low %vm642_vm8, %vm640_vm0  ;;  %vm651_vm0 = vcmp.eq.s32.totalorder %v2435_v17, %v2572_v31  ;;  %vm656_vm8 = vcmp.eq.s32.totalorder %v2461_v19, %v2588_v32 }
  0x51   :  { %195 = vmatmul.mubr.f32.vlgmr.msra.gmra.mrb[0].mxu0 %v2687_v35  ;;  %2022 = vmatprep.subr.msk.bf16.mxu1 %vm2021_vm6, %v2306_v14  ;;  %vm1991_vm15 = vmpackc.low %vm450_vm3, %vm448_vm13  ;;  %vm4000_vm6 = vcmp.eq.s32.totalorder %v2358_v2, %v2572_v31  ;;  %vm4001_vm13 = vcmp.eq.s32.totalorder %v2367_v5, %v2572_v31 }
  0x52   :  { %386 = vmatmul.mubr.f32.vlgmr.msra.gmra.mrb[0].mxu1 %v2687_v35  ;;  %1992 = vmatpush1.bf16.msk.msra.mxu0 %vm1991_vm15, %v2306_v14  ;;  %vm2023_vm3 = vmpackc.low %vm4001_vm13, %vm4000_vm6  ;;  %vm4002_vm6 = vcmp.eq.s32.totalorder %v2370_v6, %v2555_v29  ;;  %vm4003_vm13 = vcmp.eq.s32.totalorder %v2373_v7, %v2555_v29  ;;  %vm658_vm15 = vcmp.eq.s32.totalorder %v2464_v20, %v2588_v32 }
  0x53   :  { %2024 = vmatpush1.bf16.msk.msra.mxu1 %vm2023_vm3, %v2306_v14  ;;  %200 = vmatprep.mubr.f32.mxu0 %v2305_v1  ;;  %vm1993_vm9 = vmpackc.low %vm4003_vm13, %vm4002_vm6  ;;  %vm655_vm13 = vcmp.eq.s32.totalorder %v2461_v19, %v2572_v31 }
  0x54   :  { %391 = vmatprep.mubr.f32.mxu1 %v2305_v1  ;;  %1994 = vmatprep.subr.msk.bf16.mxu0 %vm1993_vm9, %v2306_v14  ;;  %vm2025_vm6 = vmpackc.low %vm646_vm11, %vm644_vm4  ;;  %vm4004_vm4 = vcmp.eq.s32.totalorder %v2370_v6, %v2569_v30  ;;  %vm4005_vm11 = vcmp.eq.s32.totalorder %v2373_v7, %v2569_v30 }
  0x55   :  { %201 = vmatmul.mubr.f32.gmra.mrb[2].mxu0 %v2758_v43  ;;  %2026 = vmatprep.subr.msk.bf16.mxu1 %vm2025_vm6, %v2306_v14  ;;  %vm1995_vm3 = vmpackc.low %vm4005_vm11, %vm4004_vm4  ;;  %vm469_vm6 = vcmp.eq.s32.totalorder %v2487_v21, %v2555_v29 }
  0x56   :  { %392 = vmatmul.mubr.f32.gmra.mrb[2].mxu1 %v2758_v43  ;;  %1996 = vmatpush1.bf16.msk.msra.mxu0 %vm1995_vm3, %v2306_v14  ;;  %vm2027_vm4 = vmpackc.low %vm645_vm14, %vm643_vm5  ;;  %vm4006_vm5 = vcmp.eq.s32.totalorder %v2409_v15, %v2555_v29  ;;  %vm4007_vm14 = vcmp.eq.s32.totalorder %v2412_v16, %v2555_v29 }
  0x57   :  { %2028 = vmatpush1.bf16.msk.msra.mxu1 %vm2027_vm4, %v2306_v14  ;;  %vm1997_vm11 = vmpackc.low %vm4007_vm14, %vm4006_vm5  ;;  %576 = vmatprep.mubr.f32.mxu0 %v2305_v1  ;;  %vm4008_vm5 = vcmp.eq.s32.totalorder %v2409_v15, %v2588_v32 }
  0x58   :  { %1998 = vmatprep.subr.msk.bf16.mxu0 %vm1997_vm11, %v2306_v14  ;;  %vm2029_vm14 = vmpackc.low %vm650_vm1, %vm4008_vm5  ;;  %767 = vmatprep.mubr.f32.mxu1 %v2305_v1  ;;  %vm660_vm5 = vcmp.eq.s32.totalorder %v2487_v21, %v2588_v32  ;;  %vm468_vm11 = vcmp.eq.s32.totalorder %v2487_v21, %v2569_v30 }
  0x59   :  { %2030 = vmatprep.subr.msk.bf16.mxu1 %vm2029_vm14, %v2306_v14  ;;  %vm1999_vm1 = vmpackc.low %vm458_vm2, %vm456_vm12  ;;  %vm4009_vm12 = vcmp.eq.s32.totalorder %v2409_v15, %v2572_v31 }
  0x5a   :  { %2000 = vmatpush1.bf16.msk.msra.mxu0 %vm1999_vm1, %v2306_v14  ;;  %vm2031_vm2 = vmpackc.low %vm649_vm7, %vm4009_vm12  ;;  %vm4010_vm7 = vcmp.eq.s32.totalorder %v2438_v18, %v2555_v29  ;;  %vm665_vm1 = vcmp.eq.s32.totalorder %v2516_v24, %v2572_v31 }
  0x5b   :  { %2032 = vmatpush1.bf16.msk.msra.mxu1 %vm2031_vm2, %v2306_v14  ;;  %vm2001_vm12 = vmpackc.low %vm4010_vm7, %vm461_vm10  ;;  %vm4011_vm10 = vcmp.eq.s32.totalorder %v2435_v17, %v2588_v32  ;;  %vm4012_vm7 = vcmp.eq.s32.totalorder %v2438_v18, %v2588_v32  ;;  %vm664_vm2 = vcmp.eq.s32.totalorder %v2513_v23, %v2588_v32 }
  0x5c   :  { %2002 = vmatprep.subr.msk.bf16.mxu0 %vm2001_vm12, %v2306_v14  ;;  %vm2033_vm3 = vmpackc.low %vm4012_vm7, %vm4011_vm10  ;;  %vm4013_vm10 = vcmp.eq.s32.totalorder %v2435_v17, %v2569_v30  ;;  %vm4014_vm7 = vcmp.eq.s32.totalorder %v2438_v18, %v2569_v30  ;;  %vm1021_vm12 = vcmp.eq.s32.totalorder %v2358_v2, %v2713_v39 }
  0x5d   :  { %2034 = vmatprep.subr.msk.bf16.mxu1 %vm2033_vm3, %v2306_v14  ;;  %vm2003_vm9 = vmpackc.low %vm4014_vm7, %vm4013_vm10  ;;  %vm4015_vm10 = vcmp.eq.s32.totalorder %v2438_v18, %v2572_v31  ;;  %vm663_vm3 = vcmp.eq.s32.totalorder %v2513_v23, %v2572_v31 }
  0x5e   :  { %2004 = vmatpush1.bf16.msk.msra.mxu0 %vm2003_vm9, %v2306_v14  ;;  %vm2035_vm7 = vmpackc.low %vm4015_vm10, %vm651_vm0  ;;  %vm4016_vm0 = vcmp.eq.s32.totalorder %v2461_v19, %v2555_v29  ;;  %vm4017_vm10 = vcmp.eq.s32.totalorder %v2464_v20, %v2555_v29  ;;  %vm478_vm9 = vcmp.eq.s32.totalorder %v2542_v28, %v2569_v30 }
  0x5f   :  { %2036 = vmatpush1.bf16.msk.msra.mxu1 %vm2035_vm7, %v2306_v14  ;;  %vm2005_vm14 = vmpackc.low %vm4017_vm10, %vm4016_vm0  ;;  %vm668_vm7 = vcmp.eq.s32.totalorder %v2534_v26, %v2588_v32  ;;  %vm1225_vm10 = vcmp.eq.s32.totalorder %v2435_v17, %v2769_v44 }
  0x60   :  { %2006 = vmatprep.subr.msk.bf16.mxu0 %vm2005_vm14, %v2306_v14  ;;  %vm2037_vm0 = vmpackc.low %vm658_vm15, %vm656_vm8  ;;  %vm4018_vm8 = vcmp.eq.s32.totalorder %v2461_v19, %v2569_v30  ;;  %vm4019_vm15 = vcmp.eq.s32.totalorder %v2464_v20, %v2569_v30  ;;  %vm476_vm14 = vcmp.eq.s32.totalorder %v2534_v26, %v2569_v30 }
  0x61   :  { %2038 = vmatprep.subr.msk.bf16.mxu1 %vm2037_vm0, %v2306_v14  ;;  %vm2007_vm4 = vmpackc.low %vm4019_vm15, %vm4018_vm8  ;;  %vm4020_vm8 = vcmp.eq.s32.totalorder %v2464_v20, %v2572_v31  ;;  %vm667_vm0 = vcmp.eq.s32.totalorder %v2534_v26, %v2572_v31 }
  0x62   :  { %2008 = vmatpush1.bf16.msk.msra.mxu0 %vm2007_vm4, %v2306_v14  ;;  %vm2039_vm15 = vmpackc.low %vm4020_vm8, %vm655_vm13  ;;  %vm4021_vm13 = vcmp.eq.s32.totalorder %v2490_v22, %v2555_v29  ;;  %vm1413_vm4 = vcmp.eq.s32.totalorder %v2412_v16, %v2789_v45 }
  0x63   :  { %2040 = vmatpush1.bf16.msk.msra.mxu1 %vm2039_vm15, %v2306_v14  ;;  %vm2009_vm8 = vmpackc.low %vm4021_vm13, %vm469_vm6  ;;  %vm4022_vm6 = vcmp.eq.s32.totalorder %v2490_v22, %v2588_v32  ;;  %vm831_vm13 = vcmp.eq.s32.totalorder %v2358_v2, %v2710_v38 }
  0x64   :  { %2010 = vmatprep.subr.msk.bf16.mxu0 %vm2009_vm8, %v2306_v14  ;;  %vm2041_vm15 = vmpackc.low %vm4022_vm6, %vm660_vm5  ;;  %vm4023_vm5 = vcmp.eq.s32.totalorder %v2490_v22, %v2569_v30 }
  0x65   :  { %2042 = vmatprep.subr.msk.bf16.mxu1 %vm2041_vm15, %v2306_v14  ;;  %vm2011_vm8 = vmpackc.low %vm4023_vm5, %vm468_vm11  ;;  %vm4024_vm15 = vcmp.eq.s32.totalorder %v2487_v21, %v2572_v31  ;;  %vm4025_vm11 = vcmp.eq.s32.totalorder %v2490_v22, %v2572_v31 }
  0x66   :  { %2012 = vmatpush1.bf16.msk.msra.mxu0 %vm2011_vm8, %v2306_v14  ;;  %vm2043_vm5 = vmpackc.low %vm4025_vm11, %vm4024_vm15  ;;  %vm4026_vm15 = vcmp.eq.s32.totalorder %v2513_v23, %v2555_v29  ;;  %vm4027_vm11 = vcmp.eq.s32.totalorder %v2516_v24, %v2555_v29 }
  0x67   :  { %2044 = vmatpush1.bf16.msk.msra.mxu1 %vm2043_vm5, %v2306_v14  ;;  %vm2013_vm6 = vmpackc.low %vm4027_vm11, %vm4026_vm15  ;;  %vm4028_vm15 = vcmp.eq.s32.totalorder %v2516_v24, %v2588_v32  ;;  %vm4046_vm5 = vcmp.eq.s32.totalorder %v2373_v7, %v2707_v37 }
  0x68   :  { %2014 = vmatprep.subr.msk.bf16.mxu0 %vm2013_vm6, %v2306_v14  ;;  %vm2045_vm11 = vmpackc.low %vm4028_vm15, %vm664_vm2  ;;  %vm4029_vm6 = vcmp.eq.s32.totalorder %v2513_v23, %v2569_v30  ;;  %vm4030_vm2 = vcmp.eq.s32.totalorder %v2516_v24, %v2569_v30 }
  0x69   :  { %2046 = vmatprep.subr.msk.bf16.mxu1 %vm2045_vm11, %v2306_v14  ;;  %vm2015_vm15 = vmpackc.low %vm4030_vm2, %vm4029_vm6  ;;  %vm1417_vm6 = vcmp.eq.s32.totalorder %v2438_v18, %v2789_v45  ;;  %vm1228_vm2 = vcmp.eq.s32.totalorder %v2461_v19, %v2748_v42 }
  0x6a   :  { %2016 = vmatpush1.bf16.msk.msra.mxu0 %vm2015_vm15, %v2306_v14  ;;  %vm2047_vm11 = vmpackc.low %vm665_vm1, %vm663_vm3  ;;  %vm4031_vm15 = vcmp.eq.s32.totalorder %v2534_v26, %v2555_v29  ;;  %vm4032_vm1 = vcmp.eq.s32.totalorder %v2542_v28, %v2555_v29 }
  0x6b   :  { %2048 = vmatpush1.bf16.msk.msra.mxu1 %vm2047_vm11, %v2306_v14  ;;  %vm2017_vm3 = vmpackc.low %vm4032_vm1, %vm4031_vm15  ;;  %vm4033_vm11 = vcmp.eq.s32.totalorder %v2542_v28, %v2588_v32  ;;  %vm1422_vm1 = vcmp.eq.s32.totalorder %v2464_v20, %v3086_v46 }
  0x6c   :  { %2018 = vmatprep.subr.msk.bf16.mxu0 %vm2017_vm3, %v2306_v14  ;;  %vm2049_vm15 = vmpackc.low %vm4033_vm11, %vm668_vm7  ;;  %vm4042_vm11 = vcmp.eq.s32.totalorder %v2373_v7, %v2710_v38 }
  0x6d   :  { %2050 = vmatprep.subr.msk.bf16.mxu1 %vm2049_vm15, %v2306_v14  ;;  %vm2019_vm7 = vmpackc.low %vm478_vm9, %vm476_vm14  ;;  %vm4034_vm9 = vcmp.eq.s32.totalorder %v2542_v28, %v2572_v31  ;;  %vm1403_vm15 = vcmp.eq.s32.totalorder %v2358_v2, %v2789_v45 }
  0x6e   :  { %2020 = vmatpush1.bf16.msk.msra.mxu0 %vm2019_vm7, %v2306_v14  ;;  %vm2051_vm14 = vmpackc.low %vm4034_vm9, %vm667_vm0  ;;  %vm4035_vm0 = vcmp.eq.s32.totalorder %v2367_v5, %v2710_v38 }
  0x6f   :  { %2052 = vmatpush1.bf16.msk.msra.mxu1 %vm2051_vm14, %v2306_v14  ;;  %vm2053_vm7 = vmpackc.low %vm4035_vm0, %vm831_vm13  ;;  %vm4036_vm14 = vcmp.eq.s32.totalorder %v2358_v2, %v2729_v40  ;;  %vm4037_vm13 = vcmp.eq.s32.totalorder %v2367_v5, %v2729_v40 }
  0x70   :  { %2054 = vmatprep.subr.msk.bf16.mxu0 %vm2053_vm7, %v2306_v14  ;;  %vm2085_vm0 = vmpackc.low %vm4037_vm13, %vm4036_vm14  ;;  %vm4038_vm7 = vcmp.eq.s32.totalorder %v2358_v2, %v2707_v37  ;;  %vm4039_vm14 = vcmp.eq.s32.totalorder %v2367_v5, %v2707_v37 }
  0x71   :  { %577 = vmatmul.mubr.f32.vlgmr.msra.gmra.mrb[4].mxu0 %v2687_v35  ;;  %2086 = vmatprep.subr.msk.bf16.mxu1 %vm2085_vm0, %v2306_v14  ;;  %vm2055_vm13 = vmpackc.low %vm4039_vm14, %vm4038_vm7  ;;  %vm4040_vm0 = vcmp.eq.s32.totalorder %v2367_v5, %v2713_v39  ;;  %vm4044_vm14 = vcmp.eq.s32.totalorder %v2373_v7, %v2729_v40 }
  0x72   :  { %768 = vmatmul.mubr.f32.vlgmr.msra.gmra.mrb[4].mxu1 %v2687_v35  ;;  %2056 = vmatpush1.bf16.msk.msra.mxu0 %vm2055_vm13, %v2306_v14  ;;  %vm2087_vm7 = vmpackc.low %vm4040_vm0, %vm1021_vm12  ;;  %vm4041_vm13 = vcmp.eq.s32.totalorder %v2370_v6, %v2710_v38  ;;  %vm4050_vm0 = vcmp.eq.s32.totalorder %v2412_v16, %v2710_v38 }
  0x73   :  { %2088 = vmatpush1.bf16.msk.msra.mxu1 %vm2087_vm7, %v2306_v14  ;;  %582 = vmatprep.mubr.f32.mxu0 %v2305_v1  ;;  %vm2057_vm12 = vmpackc.low %vm4042_vm11, %vm4041_vm13  ;;  %vm4043_vm7 = vcmp.eq.s32.totalorder %v2370_v6, %v2729_v40  ;;  %vm4045_vm13 = vcmp.eq.s32.totalorder %v2370_v6, %v2707_v37 }
  0x74   :  { %773 = vmatprep.mubr.f32.mxu1 %v2305_v1  ;;  %2058 = vmatprep.subr.msk.bf16.mxu0 %vm2057_vm12, %v2306_v14  ;;  %vm2089_vm11 = vmpackc.low %vm4044_vm14, %vm4043_vm7  ;;  %vm4047_vm12 = vcmp.eq.s32.totalorder %v2370_v6, %v2713_v39  ;;  %vm4048_vm14 = vcmp.eq.s32.totalorder %v2373_v7, %v2713_v39 }
  0x75   :  { %583 = vmatmul.mubr.f32.gmra.mrb[6].mxu0 %v2758_v43  ;;  %2090 = vmatprep.subr.msk.bf16.mxu1 %vm2089_vm11, %v2306_v14  ;;  %vm2059_vm8 = vmpackc.low %vm4046_vm5, %vm4045_vm13  ;;  %vm4049_vm11 = vcmp.eq.s32.totalorder %v2409_v15, %v2710_v38  ;;  %vm4052_vm13 = vcmp.eq.s32.totalorder %v2412_v16, %v2729_v40 }
  0x76   :  { %774 = vmatmul.mubr.f32.gmra.mrb[6].mxu1 %v2758_v43  ;;  %2060 = vmatpush1.bf16.msk.msra.mxu0 %vm2059_vm8, %v2306_v14  ;;  %vm2091_vm7 = vmpackc.low %vm4048_vm14, %vm4047_vm12  ;;  %vm4051_vm8 = vcmp.eq.s32.totalorder %v2409_v15, %v2729_v40  ;;  %vm4053_vm14 = vcmp.eq.s32.totalorder %v2409_v15, %v2707_v37 }
  0x77   :  { %2092 = vmatpush1.bf16.msk.msra.mxu1 %vm2091_vm7, %v2306_v14  ;;  %vm2061_vm5 = vmpackc.low %vm4050_vm0, %vm4049_vm11  ;;  %958 = vmatprep.mubr.f32.mxu0 %v2305_v1  ;;  %vm4054_vm0 = vcmp.eq.s32.totalorder %v2412_v16, %v2707_v37  ;;  %vm4055_vm11 = vcmp.eq.s32.totalorder %v2409_v15, %v2713_v39 }
  0x78   :  { %2062 = vmatprep.subr.msk.bf16.mxu0 %vm2061_vm5, %v2306_v14  ;;  %vm2093_vm12 = vmpackc.low %vm4052_vm13, %vm4051_vm8  ;;  %1149 = vmatprep.mubr.f32.mxu1 %v2305_v1  ;;  %vm4056_vm5 = vcmp.eq.s32.totalorder %v2412_v16, %v2713_v39  ;;  %vm4057_vm13 = vcmp.eq.s32.totalorder %v2435_v17, %v2710_v38 }
  0x79   :  { %2094 = vmatprep.subr.msk.bf16.mxu1 %vm2093_vm12, %v2306_v14  ;;  %vm2063_vm7 = vmpackc.low %vm4054_vm0, %vm4053_vm14  ;;  %vm4058_vm12 = vcmp.eq.s32.totalorder %v2438_v18, %v2710_v38  ;;  %vm4059_vm14 = vcmp.eq.s32.totalorder %v2435_v17, %v2729_v40  ;;  %vm4060_vm0 = vcmp.eq.s32.totalorder %v2438_v18, %v2729_v40 }
  0x7a   :  { %2064 = vmatpush1.bf16.msk.msra.mxu0 %vm2063_vm7, %v2306_v14  ;;  %vm2095_vm8 = vmpackc.low %vm4056_vm5, %vm4055_vm11  ;;  %vm4061_vm11 = vcmp.eq.s32.totalorder %v2435_v17, %v2707_v37  ;;  %vm4062_vm5 = vcmp.eq.s32.totalorder %v2438_v18, %v2707_v37 }
  0x7b   :  { %2096 = vmatpush1.bf16.msk.msra.mxu1 %vm2095_vm8, %v2306_v14  ;;  %vm2065_vm9 = vmpackc.low %vm4058_vm12, %vm4057_vm13  ;;  %vm4064_vm13 = vcmp.eq.s32.totalorder %v2438_v18, %v2713_v39 }
  0x7c   :  { %2066 = vmatprep.subr.msk.bf16.mxu0 %vm2065_vm9, %v2306_v14  ;;  %vm2097_vm7 = vmpackc.low %vm4060_vm0, %vm4059_vm14  ;;  %vm4063_vm9 = vcmp.eq.s32.totalorder %v2435_v17, %v2713_v39  ;;  %vm4065_vm14 = vcmp.eq.s32.totalorder %v2461_v19, %v2710_v38  ;;  %vm4066_vm0 = vcmp.eq.s32.totalorder %v2464_v20, %v2710_v38 }
  0x7d   :  { %2098 = vmatprep.subr.msk.bf16.mxu1 %vm2097_vm7, %v2306_v14  ;;  %vm2067_vm8 = vmpackc.low %vm4062_vm5, %vm4061_vm11  ;;  %vm4067_vm11 = vcmp.eq.s32.totalorder %v2461_v19, %v2729_v40  ;;  %vm4068_vm5 = vcmp.eq.s32.totalorder %v2464_v20, %v2729_v40 }
  0x7e   :  { %2068 = vmatpush1.bf16.msk.msra.mxu0 %vm2067_vm8, %v2306_v14  ;;  %vm2099_vm12 = vmpackc.low %vm4064_vm13, %vm4063_vm9  ;;  %vm4069_vm9 = vcmp.eq.s32.totalorder %v2461_v19, %v2707_v37  ;;  %vm4070_vm13 = vcmp.eq.s32.totalorder %v2464_v20, %v2707_v37 }
  0x7f   :  { %2100 = vmatpush1.bf16.msk.msra.mxu1 %vm2099_vm12, %v2306_v14  ;;  %vm2069_vm7 = vmpackc.low %vm4066_vm0, %vm4065_vm14  ;;  %vm4071_vm14 = vcmp.eq.s32.totalorder %v2461_v19, %v2713_v39  ;;  %vm4072_vm0 = vcmp.eq.s32.totalorder %v2464_v20, %v2713_v39 }
  0x80   :  { %2070 = vmatprep.subr.msk.bf16.mxu0 %vm2069_vm7, %v2306_v14  ;;  %vm2101_vm8 = vmpackc.low %vm4068_vm5, %vm4067_vm11  ;;  %vm4073_vm11 = vcmp.eq.s32.totalorder %v2487_v21, %v2710_v38  ;;  %vm4074_vm5 = vcmp.eq.s32.totalorder %v2490_v22, %v2710_v38 }
  0x81   :  { %2102 = vmatprep.subr.msk.bf16.mxu1 %vm2101_vm8, %v2306_v14  ;;  %vm2071_vm12 = vmpackc.low %vm4070_vm13, %vm4069_vm9  ;;  %vm4075_vm9 = vcmp.eq.s32.totalorder %v2487_v21, %v2729_v40  ;;  %vm4076_vm13 = vcmp.eq.s32.totalorder %v2490_v22, %v2729_v40 }
  0x82   :  { %2072 = vmatpush1.bf16.msk.msra.mxu0 %vm2071_vm12, %v2306_v14  ;;  %vm2103_vm7 = vmpackc.low %vm4072_vm0, %vm4071_vm14  ;;  %vm4077_vm14 = vcmp.eq.s32.totalorder %v2487_v21, %v2707_v37  ;;  %vm4078_vm0 = vcmp.eq.s32.totalorder %v2490_v22, %v2707_v37 }
  0x83   :  { %2104 = vmatpush1.bf16.msk.msra.mxu1 %vm2103_vm7, %v2306_v14  ;;  %vm2073_vm8 = vmpackc.low %vm4074_vm5, %vm4073_vm11  ;;  %vm4079_vm11 = vcmp.eq.s32.totalorder %v2487_v21, %v2713_v39  ;;  %vm4080_vm5 = vcmp.eq.s32.totalorder %v2490_v22, %v2713_v39 }
  0x84   :  { %2074 = vmatprep.subr.msk.bf16.mxu0 %vm2073_vm8, %v2306_v14  ;;  %vm2105_vm12 = vmpackc.low %vm4076_vm13, %vm4075_vm9  ;;  %vm4081_vm9 = vcmp.eq.s32.totalorder %v2513_v23, %v2710_v38  ;;  %vm4082_vm13 = vcmp.eq.s32.totalorder %v2516_v24, %v2710_v38 }
  0x85   :  { %2106 = vmatprep.subr.msk.bf16.mxu1 %vm2105_vm12, %v2306_v14  ;;  %vm2075_vm7 = vmpackc.low %vm4078_vm0, %vm4077_vm14  ;;  %vm4083_vm14 = vcmp.eq.s32.totalorder %v2513_v23, %v2729_v40  ;;  %vm4084_vm0 = vcmp.eq.s32.totalorder %v2516_v24, %v2729_v40 }
  0x86   :  { %2076 = vmatpush1.bf16.msk.msra.mxu0 %vm2075_vm7, %v2306_v14  ;;  %vm2107_vm8 = vmpackc.low %vm4080_vm5, %vm4079_vm11  ;;  %vm4085_vm11 = vcmp.eq.s32.totalorder %v2513_v23, %v2707_v37  ;;  %vm4086_vm5 = vcmp.eq.s32.totalorder %v2516_v24, %v2707_v37 }
  0x87   :  { %2108 = vmatpush1.bf16.msk.msra.mxu1 %vm2107_vm8, %v2306_v14  ;;  %vm2077_vm12 = vmpackc.low %vm4082_vm13, %vm4081_vm9  ;;  %vm4087_vm9 = vcmp.eq.s32.totalorder %v2513_v23, %v2713_v39  ;;  %vm4088_vm13 = vcmp.eq.s32.totalorder %v2516_v24, %v2713_v39 }
  0x88   :  { %2078 = vmatprep.subr.msk.bf16.mxu0 %vm2077_vm12, %v2306_v14  ;;  %vm2109_vm7 = vmpackc.low %vm4084_vm0, %vm4083_vm14  ;;  %vm4089_vm14 = vcmp.eq.s32.totalorder %v2534_v26, %v2710_v38  ;;  %vm4090_vm0 = vcmp.eq.s32.totalorder %v2542_v28, %v2710_v38 }
  0x89   :  { %2110 = vmatprep.subr.msk.bf16.mxu1 %vm2109_vm7, %v2306_v14  ;;  %vm2079_vm8 = vmpackc.low %vm4086_vm5, %vm4085_vm11  ;;  %vm4091_vm11 = vcmp.eq.s32.totalorder %v2534_v26, %v2729_v40  ;;  %vm4092_vm5 = vcmp.eq.s32.totalorder %v2542_v28, %v2729_v40 }
  0x8a   :  { %2080 = vmatpush1.bf16.msk.msra.mxu0 %vm2079_vm8, %v2306_v14  ;;  %vm2111_vm12 = vmpackc.low %vm4088_vm13, %vm4087_vm9  ;;  %vm1213_vm9 = vcmp.eq.s32.totalorder %v2358_v2, %v2769_v44  ;;  %vm4093_vm13 = vcmp.eq.s32.totalorder %v2534_v26, %v2707_v37 }
  0x8b   :  { %2112 = vmatpush1.bf16.msk.msra.mxu1 %vm2111_vm12, %v2306_v14  ;;  %vm2081_vm7 = vmpackc.low %vm4090_vm0, %vm4089_vm14  ;;  %vm4094_vm12 = vcmp.eq.s32.totalorder %v2542_v28, %v2707_v37  ;;  %vm1404_vm0 = vcmp.eq.s32.totalorder %v2358_v2, %v3086_v46 }
  0x8c   :  { %2082 = vmatprep.subr.msk.bf16.mxu0 %vm2081_vm7, %v2306_v14  ;;  %vm2113_vm8 = vmpackc.low %vm4092_vm5, %vm4091_vm11  ;;  %vm4095_vm7 = vcmp.eq.s32.totalorder %v2534_v26, %v2713_v39  ;;  %vm4096_vm11 = vcmp.eq.s32.totalorder %v2542_v28, %v2713_v39 }
  0x8d   :  { %2114 = vmatprep.subr.msk.bf16.mxu1 %vm2113_vm8, %v2306_v14  ;;  %vm2083_vm14 = vmpackc.low %vm4094_vm12, %vm4093_vm13  ;;  %vm1212_vm8 = vcmp.eq.s32.totalorder %v2358_v2, %v2748_v42  ;;  %vm4097_vm13 = vcmp.eq.s32.totalorder %v2367_v5, %v2769_v44 }
  0x8e   :  { %2084 = vmatpush1.bf16.msk.msra.mxu0 %vm2083_vm14, %v2306_v14  ;;  %vm2115_vm5 = vmpackc.low %vm4096_vm11, %vm4095_vm7  ;;  %vm4098_vm14 = vcmp.eq.s32.totalorder %v2367_v5, %v3086_v46  ;;  %vm4099_vm7 = vcmp.eq.s32.totalorder %v2367_v5, %v2748_v42 }
  0x8f   :  { %2116 = vmatpush1.bf16.msk.msra.mxu1 %vm2115_vm5, %v2306_v14  ;;  %vm2117_vm12 = vmpackc.low %vm4097_vm13, %vm1213_vm9  ;;  %vm4100_vm9 = vcmp.eq.s32.totalorder %v2367_v5, %v2789_v45 }
  0x90   :  { %2118 = vmatprep.subr.msk.bf16.mxu0 %vm2117_vm12, %v2306_v14  ;;  %vm2149_vm3 = vmpackc.low %vm4098_vm14, %vm1404_vm0  ;;  %vm4101_vm0 = vcmp.eq.s32.totalorder %v2370_v6, %v2769_v44  ;;  %vm4105_vm14 = vcmp.eq.s32.totalorder %v2370_v6, %v2748_v42 }
  0x91   :  { %959 = vmatmul.mubr.f32.vlgmr.msra.gmra.mrb[8].mxu0 %v2687_v35  ;;  %2150 = vmatprep.subr.msk.bf16.mxu1 %vm2149_vm3, %v2306_v14  ;;  %vm2119_vm11 = vmpackc.low %vm4099_vm7, %vm1212_vm8  ;;  %vm4102_vm3 = vcmp.eq.s32.totalorder %v2373_v7, %v2769_v44  ;;  %vm4103_vm8 = vcmp.eq.s32.totalorder %v2370_v6, %v3086_v46  ;;  %vm4106_vm7 = vcmp.eq.s32.totalorder %v2373_v7, %v2748_v42 }
  0x92   :  { %1150 = vmatmul.mubr.f32.vlgmr.msra.gmra.mrb[8].mxu1 %v2687_v35  ;;  %2120 = vmatpush1.bf16.msk.msra.mxu0 %vm2119_vm11, %v2306_v14  ;;  %vm2151_vm5 = vmpackc.low %vm4100_vm9, %vm1403_vm15  ;;  %vm4104_vm15 = vcmp.eq.s32.totalorder %v2373_v7, %v3086_v46  ;;  %vm4107_vm9 = vcmp.eq.s32.totalorder %v2370_v6, %v2789_v45 }
  0x93   :  { %2152 = vmatpush1.bf16.msk.msra.mxu1 %vm2151_vm5, %v2306_v14  ;;  %964 = vmatprep.mubr.f32.mxu0 %v2305_v1  ;;  %vm2121_vm13 = vmpackc.low %vm4102_vm3, %vm4101_vm0  ;;  %vm4108_vm5 = vcmp.eq.s32.totalorder %v2373_v7, %v2789_v45  ;;  %vm4109_vm3 = vcmp.eq.s32.totalorder %v2409_v15, %v2769_v44 }
  0x94   :  { %1155 = vmatprep.mubr.f32.mxu1 %v2305_v1  ;;  %2122 = vmatprep.subr.msk.bf16.mxu0 %vm2121_vm13, %v2306_v14  ;;  %vm2153_vm12 = vmpackc.low %vm4104_vm15, %vm4103_vm8  ;;  %vm4110_vm13 = vcmp.eq.s32.totalorder %v2412_v16, %v2769_v44  ;;  %vm4111_vm15 = vcmp.eq.s32.totalorder %v2409_v15, %v3086_v46 }
  0x95   :  { %965 = vmatmul.mubr.f32.gmra.mrb[10].mxu0 %v2758_v43  ;;  %2154 = vmatprep.subr.msk.bf16.mxu1 %vm2153_vm12, %v2306_v14  ;;  %vm2123_vm11 = vmpackc.low %vm4106_vm7, %vm4105_vm14  ;;  %vm4112_vm12 = vcmp.eq.s32.totalorder %v2412_v16, %v3086_v46  ;;  %vm4113_vm7 = vcmp.eq.s32.totalorder %v2409_v15, %v2748_v42 }
  0x96   :  { %1156 = vmatmul.mubr.f32.gmra.mrb[10].mxu1 %v2758_v43  ;;  %2124 = vmatpush1.bf16.msk.msra.mxu0 %vm2123_vm11, %v2306_v14  ;;  %vm2155_vm0 = vmpackc.low %vm4108_vm5, %vm4107_vm9  ;;  %vm4114_vm11 = vcmp.eq.s32.totalorder %v2412_v16, %v2748_v42  ;;  %vm4115_vm5 = vcmp.eq.s32.totalorder %v2409_v15, %v2789_v45 }
  0x97   :  { %2156 = vmatpush1.bf16.msk.msra.mxu1 %vm2155_vm0, %v2306_v14  ;;  %vm2125_vm8 = vmpackc.low %vm4110_vm13, %vm4109_vm3  ;;  %1340 = vmatprep.mubr.f32.mxu0 %v2305_v1  ;;  %vm4116_vm3 = vcmp.eq.s32.totalorder %v2438_v18, %v2769_v44 }
  0x98   :  { %2126 = vmatprep.subr.msk.bf16.mxu0 %vm2125_vm8, %v2306_v14  ;;  %vm2157_vm14 = vmpackc.low %vm4112_vm12, %vm4111_vm15  ;;  %1531 = vmatprep.mubr.f32.mxu1 %v2305_v1  ;;  %vm4117_vm8 = vcmp.eq.s32.totalorder %v2435_v17, %v3086_v46  ;;  %vm4118_vm15 = vcmp.eq.s32.totalorder %v2438_v18, %v3086_v46 }
  0x99   :  { %2158 = vmatprep.subr.msk.bf16.mxu1 %vm2157_vm14, %v2306_v14  ;;  %vm2127_vm9 = vmpackc.low %vm4114_vm11, %vm4113_vm7  ;;  %vm4120_vm14 = vcmp.eq.s32.totalorder %v2438_v18, %v2748_v42 }
  0x9a   :  { %2128 = vmatpush1.bf16.msk.msra.mxu0 %vm2127_vm9, %v2306_v14  ;;  %vm2159_vm0 = vmpackc.low %vm1413_vm4, %vm4115_vm5  ;;  %vm4119_vm4 = vcmp.eq.s32.totalorder %v2435_v17, %v2748_v42  ;;  %vm4122_vm9 = vcmp.eq.s32.totalorder %v2461_v19, %v2769_v44  ;;  %vm4123_vm5 = vcmp.eq.s32.totalorder %v2464_v20, %v2769_v44 }
  0x9b   :  { %2160 = vmatpush1.bf16.msk.msra.mxu1 %vm2159_vm0, %v2306_v14  ;;  %vm2129_vm13 = vmpackc.low %vm4116_vm3, %vm1225_vm10  ;;  %vm4121_vm10 = vcmp.eq.s32.totalorder %v2435_v17, %v2789_v45  ;;  %vm4124_vm3 = vcmp.eq.s32.totalorder %v2461_v19, %v3086_v46 }
  0x9c   :  { %2130 = vmatprep.subr.msk.bf16.mxu0 %vm2129_vm13, %v2306_v14  ;;  %vm2161_vm12 = vmpackc.low %vm4118_vm15, %vm4117_vm8  ;;  %vm4126_vm15 = vcmp.eq.s32.totalorder %v2461_v19, %v2789_v45 }
  0x9d   :  { %2162 = vmatprep.subr.msk.bf16.mxu1 %vm2161_vm12, %v2306_v14  ;;  %vm2131_vm7 = vmpackc.low %vm4120_vm14, %vm4119_vm4  ;;  %vm4127_vm12 = vcmp.eq.s32.totalorder %v2464_v20, %v2789_v45  ;;  %vm4129_vm14 = vcmp.eq.s32.totalorder %v2490_v22, %v2769_v44 }
  0x9e   :  { %2132 = vmatpush1.bf16.msk.msra.mxu0 %vm2131_vm7, %v2306_v14  ;;  %vm2163_vm11 = vmpackc.low %vm1417_vm6, %vm4121_vm10  ;;  %vm4125_vm6 = vcmp.eq.s32.totalorder %v2464_v20, %v2748_v42  ;;  %vm4131_vm10 = vcmp.eq.s32.totalorder %v2490_v22, %v3086_v46 }
  0x9f   :  { %2164 = vmatpush1.bf16.msk.msra.mxu1 %vm2163_vm11, %v2306_v14  ;;  %vm2133_vm0 = vmpackc.low %vm4123_vm5, %vm4122_vm9  ;;  %vm4132_vm9 = vcmp.eq.s32.totalorder %v2487_v21, %v2748_v42  ;;  %vm4133_vm5 = vcmp.eq.s32.totalorder %v2490_v22, %v2748_v42 }
  0xa0   :  { %2134 = vmatprep.subr.msk.bf16.mxu0 %vm2133_vm0, %v2306_v14  ;;  %vm2165_vm13 = vmpackc.low %vm1422_vm1, %vm4124_vm3  ;;  %vm4128_vm1 = vcmp.eq.s32.totalorder %v2487_v21, %v2769_v44  ;;  %vm4134_vm3 = vcmp.eq.s32.totalorder %v2487_v21, %v2789_v45 }
  0xa1   :  { %2166 = vmatprep.subr.msk.bf16.mxu1 %vm2165_vm13, %v2306_v14  ;;  %vm2135_vm8 = vmpackc.low %vm4125_vm6, %vm1228_vm2  ;;  %vm4130_vm2 = vcmp.eq.s32.totalorder %v2487_v21, %v3086_v46  ;;  %vm4135_vm13 = vcmp.eq.s32.totalorder %v2490_v22, %v2789_v45 }
  0xa2   :  { %2136 = vmatpush1.bf16.msk.msra.mxu0 %vm2135_vm8, %v2306_v14  ;;  %vm2167_vm4 = vmpackc.low %vm4127_vm12, %vm4126_vm15  ;;  %vm4136_vm8 = vcmp.eq.s32.totalorder %v2513_v23, %v2769_v44  ;;  %vm4137_vm15 = vcmp.eq.s32.totalorder %v2516_v24, %v2769_v44 }
  0xa3   :  { %2168 = vmatpush1.bf16.msk.msra.mxu1 %vm2167_vm4, %v2306_v14  ;;  %vm2137_vm7 = vmpackc.low %vm4129_vm14, %vm4128_vm1  ;;  %vm4138_vm4 = vcmp.eq.s32.totalorder %v2513_v23, %v3086_v46  ;;  %vm4139_vm1 = vcmp.eq.s32.totalorder %v2516_v24, %v3086_v46 }
  0xa4   :  { %2138 = vmatprep.subr.msk.bf16.mxu0 %vm2137_vm7, %v2306_v14  ;;  %vm2169_vm11 = vmpackc.low %vm4131_vm10, %vm4130_vm2  ;;  %vm4140_vm7 = vcmp.eq.s32.totalorder %v2513_v23, %v2748_v42  ;;  %vm4141_vm2 = vcmp.eq.s32.totalorder %v2516_v24, %v2748_v42 }
  0xa5   :  { %2170 = vmatprep.subr.msk.bf16.mxu1 %vm2169_vm11, %v2306_v14  ;;  %vm2139_vm0 = vmpackc.low %vm4133_vm5, %vm4132_vm9  ;;  %vm4142_vm11 = vcmp.eq.s32.totalorder %v2513_v23, %v2789_v45  ;;  %vm4143_vm9 = vcmp.eq.s32.totalorder %v2516_v24, %v2789_v45 }
  0xa6   :  { %2140 = vmatpush1.bf16.msk.msra.mxu0 %vm2139_vm0, %v2306_v14  ;;  %vm2171_vm6 = vmpackc.low %vm4135_vm13, %vm4134_vm3  ;;  %vm4144_vm0 = vcmp.eq.s32.totalorder %v2534_v26, %v2769_v44  ;;  %vm4145_vm3 = vcmp.eq.s32.totalorder %v2542_v28, %v2769_v44 }
  0xa7   :  { %2172 = vmatpush1.bf16.msk.msra.mxu1 %vm2171_vm6, %v2306_v14  ;;  %vm2141_vm12 = vmpackc.low %vm4137_vm15, %vm4136_vm8  ;;  %vm4146_vm6 = vcmp.eq.s32.totalorder %v2534_v26, %v3086_v46  ;;  %vm4147_vm8 = vcmp.eq.s32.totalorder %v2542_v28, %v3086_v46 }
  0xa8   :  { %2142 = vmatprep.subr.msk.bf16.mxu0 %vm2141_vm12, %v2306_v14  ;;  %vm2173_vm14 = vmpackc.low %vm4139_vm1, %vm4138_vm4  ;;  %vm4148_vm12 = vcmp.eq.s32.totalorder %v2534_v26, %v2748_v42  ;;  %vm4149_vm4 = vcmp.eq.s32.totalorder %v2542_v28, %v2748_v42 }
  0xa9   :  { %2174 = vmatprep.subr.msk.bf16.mxu1 %vm2173_vm14, %v2306_v14  ;;  %vm2143_vm10 = vmpackc.low %vm4141_vm2, %vm4140_vm7  ;;  %vm4150_vm14 = vcmp.eq.s32.totalorder %v2534_v26, %v2789_v45  ;;  %vm4151_vm7 = vcmp.eq.s32.totalorder %v2542_v28, %v2789_v45 }
  0xaa   :  { %2144 = vmatpush1.bf16.msk.msra.mxu0 %vm2143_vm10, %v2306_v14  ;;  %vm2175_vm5 = vmpackc.low %vm4143_vm9, %vm4142_vm11  ;;  %vm1650_vm10 = vcmp.lt.s32.totalorder %v40_v0, 256 }
  0xab   :  { %2176 = vmatpush1.bf16.msk.msra.mxu1 %vm2175_vm5, %v2306_v14  ;;  %vm2145_vm13 = vmpackc.low %vm4145_vm3, %vm4144_vm0 }
  0xac   :  { %2146 = vmatprep.subr.msk.bf16.mxu0 %vm2145_vm13, %v2306_v14  ;;  %vm2177_vm15 = vmpackc.low %vm4147_vm8, %vm4146_vm6 }
  0xad   :  { %2178 = vmatprep.subr.msk.bf16.mxu1 %vm2177_vm15, %v2306_v14  ;;  %vm2147_vm1 = vmpackc.low %vm4149_vm4, %vm4148_vm12 }
  0xae   :  { %2148 = vmatpush1.bf16.msk.msra.mxu0 %vm2147_vm1, %v2306_v14  ;;  %vm2179_vm2 = vmpackc.low %vm4151_vm7, %vm4150_vm14 }
  0xaf   :  { %2180 = vmatpush1.bf16.msk.msra.mxu1 %vm2179_vm2, %v2306_v14 }
  0xb1   :  { %1341 = vmatmul.mubr.f32.vlgmr.msra.gmra.mrb[12].mxu0 %v2687_v35 }
  0xb2   :  { %1532 = vmatmul.mubr.f32.vlgmr.msra.gmra.mrb[12].mxu1 %v2687_v35  ;;  %1346 = vmatprep.mubr.f32.mxu0 %v2305_v1 }
  0xb3   :  { %1537 = vmatprep.mubr.f32.mxu1 %v2305_v1 }
  0xb5   :  { %1347 = vmatmul.mubr.f32.gmra.mrb[14].mxu0 %v2758_v43 }
  0xb6   :  { %1538 = vmatmul.mubr.f32.gmra.mrb[14].mxu1 %v2758_v43 }
 0x124   :  { %v3758_v47 = vpop.f32.mrb[0].mxu0 }
 0x125   :  { %v3760_v48 = vpop.f32.mrb[1].mxu0  ;;  %v3762_v49 = vpop.f32.mrb[0].mxu1  ;;  %v207_v53 = vmul.f32 %v3758_v47, %v3758_v47 }
 0x126   :  { %v3764_v50 = vpop.f32.mrb[1].mxu1  ;;  %v398_v51 = vmul.f32 %v3762_v49, %v3762_v49  ;;  %v208_v57 = vmul.f32 %v3760_v48, %v3760_v48 }
 0x127   :  { %v399_v61 = vmul.f32 %v3764_v50, %v3764_v50 }
 0x128   :  { %v202_v52 = vpop.f32.mrb[2].mxu0 }
 0x129   :  { %v209_v54 = vmul.f32 %v202_v52, %v202_v52  ;;  %v393_v55 = vpop.f32.mrb[2].mxu1  ;;  %v204_v56 = vpop.f32.mrb[3].mxu0 }
 0x12a   :  { %v400_v58 = vmul.f32 %v393_v55, %v393_v55  ;;  %v210_v59 = vmul.f32 %v204_v56, %v204_v56  ;;  %v3772_v60 = vpop.f32.mrb[3].mxu1 }
 0x12b   :  { %v211_v62 = vadd.f32 %v209_v54, %v207_v53  ;;  %v401_v63 = vmul.f32 %v3772_v60, %v3772_v60 }
 0x12c   :  { %v402_v1 = vadd.f32 %v400_v58, %v398_v51  ;;  %v218_v3 = vadd.f32 %v210_v59, %v208_v57 }
 0x12d   :  { %v212_v4 = vrot.slane %v211_v62, 4  ;;  %v409_v5 = vadd.f32 %v401_v63, %v399_v61 }
 0x12e   :  { %v403_v6 = vrot.slane %v402_v1, 4  ;;  %v219_v7 = vrot.slane %v218_v3, 4 }
 0x12f   :  { %v213_v8 = vadd.f32 %v212_v4, %v211_v62  ;;  %v410_v9 = vrot.slane %v409_v5, 4 }
 0x130   :  { %v404_v10 = vadd.f32 %v403_v6, %v402_v1  ;;  %v220_v11 = vadd.f32 %v219_v7, %v218_v3 }
 0x131   :  { %v214_v12 = vrot.slane %v213_v8, 2  ;;  %v411_v13 = vadd.f32 %v410_v9, %v409_v5 }
 0x132   :  { %v405_v14 = vrot.slane %v404_v10, 2  ;;  %v221_v15 = vrot.slane %v220_v11, 2 }
 0x133   :  { %v215_v16 = vadd.f32 %v214_v12, %v213_v8  ;;  %v412_v17 = vrot.slane %v411_v13, 2 }
 0x134   :  { %v406_v18 = vadd.f32 %v405_v14, %v404_v10  ;;  %v222_v19 = vadd.f32 %v221_v15, %v220_v11 }
 0x135   :  { %v216_v20 = vrot.slane %v215_v16, 1  ;;  %v413_v21 = vadd.f32 %v412_v17, %v411_v13 }
 0x136   :  { %v407_v22 = vrot.slane %v406_v18, 1  ;;  %v223_v23 = vrot.slane %v222_v19, 1 }
 0x137   :  { %v217_v24 = vadd.f32 %v216_v20, %v215_v16  ;;  %v414_v25 = vrot.slane %v413_v21, 1 }
 0x138   :  { %v408_v26 = vadd.f32 %v407_v22, %v406_v18  ;;  %v224_v27 = vadd.f32 %v223_v23, %v222_v19 }
 0x139   :  { %v225_v28 = vadd.f32 1.0, %v217_v24  ;;  %v415_v29 = vadd.f32 %v414_v25, %v413_v21 }
 0x13a   :  { %v416_v30 = vadd.f32 1.0, %v408_v26  ;;  %v226_v31 = vadd.f32 1.0, %v224_v27 }
 0x13b   :  { %2189 = vrsqrt.f32 %v225_v28  ;;  %v417_v32 = vadd.f32 1.0, %v415_v29 }
 0x13c   :  { %2191 = vrsqrt.f32 %v416_v30 }
 0x13d   :  { %2193 = vrsqrt.f32 %v226_v31 }
 0x13e   :  { %2195 = vrsqrt.f32 %v417_v32 }
 0x144   :  { %v3778_v33 = vpop.f32.mrb[4].mxu0 }
 0x145   :  { %v2190_v34 = vpop.eup %2189  ;;  %v589_v35 = vmul.f32 %v3778_v33, %v3778_v33  ;;  %v3782_v36 = vpop.f32.mrb[5].mxu0 }
 0x146   :  { %v3784_v37 = vpop.f32.mrb[4].mxu1  ;;  %v2192_v38 = vpop.eup %2191  ;;  %v229_v39 = vmul.f32 %v2190_v34, %v2190_v34  ;;  %v241_v40 = vmul.f32 %v2190_v34, %v202_v52  ;;  %v590_v41 = vmul.f32 %v3782_v36, %v3782_v36  ;;  %v239_v53 = vmul.f32 %v2190_v34, %v3758_v47 }
 0x147   :  { %v780_v42 = vmul.f32 %v3784_v37, %v3784_v37  ;;  %v3790_v43 = vpop.f32.mrb[5].mxu1  ;;  %v2194_v44 = vpop.eup %2193  ;;  %v420_v45 = vmul.f32 %v2192_v38, %v2192_v38  ;;  %v432_v46 = vmul.f32 %v2192_v38, %v393_v55  ;;  %v3797_v61 = vadd.f32 %v2192_v38, %v2190_v34 }
 0x148   :  { %v781_v51 = vmul.f32 %v3790_v43, %v3790_v43  ;;  %v2196_v54 = vpop.eup %2195  ;;  %v235_v57 = vmul.f32 %v229_v39, %v217_v24  ;;  %v230_v58 = vmul.f32 %v2194_v44, %v2194_v44  ;;  %v242_v52 = vmul.f32 %v2194_v44, %v204_v56  ;;  %v3795_v59 = vpop.f32.mrb[6].mxu0 }
 0x149   :  { %v3799_v62 = vadd.f32 %v420_v45, %v229_v39  ;;  %v426_v63 = vmul.f32 %v420_v45, %v408_v26  ;;  %v3801_v1 = vadd.f32 %v432_v46, %v241_v40  ;;  %v421_v3 = vmul.f32 %v2196_v54, %v2196_v54  ;;  %v3803_v55 = vpop.f32.mrb[6].mxu1  ;;  %v3805_v4 = vpop.f32.mrb[7].mxu0 }
 0x14a   :  { %v236_v5 = vmul.f32 %v230_v58, %v224_v27  ;;  %v433_v47 = vmul.f32 %v2196_v54, %v3772_v60  ;;  %v591_v56 = vmul.f32 %v3795_v59, %v3795_v59  ;;  %v782_v6 = vmul.f32 %v3803_v55, %v3803_v55  ;;  %v3812_v7 = vpop.f32.mrb[7].mxu1 }
 0x14b   :  { %v3814_v8 = vadd.f32 %v426_v63, %v235_v57  ;;  %v3816_v9 = vadd.f32 %v421_v3, %v230_v58  ;;  %v427_v10 = vmul.f32 %v421_v3, %v415_v29  ;;  %v592_v11 = vmul.f32 %v3805_v4, %v3805_v4 }
 0x14c   :  { %v3820_v12 = vadd.f32 %v433_v47, %v242_v52  ;;  %v593_v13 = vadd.f32 %v591_v56, %v589_v35  ;;  %v784_v60 = vadd.f32 %v782_v6, %v780_v42  ;;  %v783_v14 = vmul.f32 %v3812_v7, %v3812_v7 }
 0x14d   :  { %v3824_v15 = vadd.f32 %v427_v10, %v236_v5  ;;  %v600_v16 = vadd.f32 %v592_v11, %v590_v41  ;;  %v430_v17 = vmul.f32 %v2192_v38, %v3762_v49  ;;  %v240_v18 = vmul.f32 %v2194_v44, %v3760_v48 }
 0x14e   :  { %v594_v19 = vrot.slane %v593_v13, 4  ;;  %v785_v20 = vrot.slane %v784_v60, 4  ;;  %v791_v21 = vadd.f32 %v783_v14, %v781_v51  ;;  %v3828_v22 = vadd.f32 %v2196_v54, %v2194_v44 }
 0x14f   :  { %v601_v23 = vrot.slane %v600_v16, 4  ;;  %v3830_v24 = vadd.f32 %v430_v17, %v239_v53  ;;  %v431_v25 = vmul.f32 %v2196_v54, %v3764_v50 }
 0x150   :  { %v595_v26 = vadd.f32 %v594_v19, %v593_v13  ;;  %v786_v27 = vadd.f32 %v785_v20, %v784_v60  ;;  %v792_v28 = vrot.slane %v791_v21, 4 }
 0x151   :  { %v602_v29 = vadd.f32 %v601_v23, %v600_v16  ;;  %v3833_v30 = vadd.f32 %v431_v25, %v240_v18 }
 0x152   :  { %v596_v31 = vrot.slane %v595_v26, 2  ;;  %v787_v49 = vrot.slane %v786_v27, 2  ;;  %v793_v32 = vadd.f32 %v792_v28, %v791_v21 }
 0x153   :  { %v603_v48 = vrot.slane %v602_v29, 2 }
 0x154   :  { %v597_v34 = vadd.f32 %v596_v31, %v595_v26  ;;  %v788_v35 = vadd.f32 %v787_v49, %v786_v27  ;;  %v794_v38 = vrot.slane %v793_v32, 2 }
 0x155   :  { %v604_v39 = vadd.f32 %v603_v48, %v602_v29 }
 0x156   :  { %v598_v40 = vrot.slane %v597_v34, 1  ;;  %v789_v41 = vrot.slane %v788_v35, 1  ;;  %v795_v42 = vadd.f32 %v794_v38, %v793_v32 }
 0x157   :  { %v605_v44 = vrot.slane %v604_v39, 1 }
 0x158   :  { %v599_v45 = vadd.f32 %v598_v40, %v597_v34  ;;  %v790_v50 = vadd.f32 %v789_v41, %v788_v35  ;;  %v796_v46 = vrot.slane %v795_v42, 1 }
 0x159   :  { %v606_v51 = vadd.f32 %v605_v44, %v604_v39 }
 0x15a   :  { %v607_v53 = vadd.f32 1.0, %v599_v45  ;;  %v798_v54 = vadd.f32 1.0, %v790_v50  ;;  %v797_v57 = vadd.f32 %v796_v46, %v795_v42 }
 0x15b   :  { %v608_v58 = vadd.f32 1.0, %v606_v51 }
 0x15c   :  { %2197 = vrsqrt.f32 %v607_v53  ;;  %v799_v52 = vadd.f32 1.0, %v797_v57 }
 0x15d   :  { %2199 = vrsqrt.f32 %v798_v54 }
 0x15e   :  { %2201 = vrsqrt.f32 %v608_v58 }
 0x15f   :  { %2203 = vrsqrt.f32 %v799_v52 }
 0x164   :  { %v3835_v63 = vpop.f32.mrb[8].mxu0 }
 0x165   :  { %v3837_v3 = vpop.f32.mrb[9].mxu0  ;;  %v3839_v5 = vpop.f32.mrb[8].mxu1  ;;  %v971_v56 = vmul.f32 %v3835_v63, %v3835_v63 }
 0x166   :  { %v2198_v47 = vpop.eup %2197  ;;  %v972_v6 = vmul.f32 %v3837_v3, %v3837_v3  ;;  %v1162_v10 = vmul.f32 %v3839_v5, %v3839_v5  ;;  %v3847_v11 = vpop.f32.mrb[9].mxu1 }
 0x167   :  { %v2200_v13 = vpop.eup %2199  ;;  %v611_v60 = vmul.f32 %v2198_v47, %v2198_v47  ;;  %v623_v14 = vmul.f32 %v2198_v47, %v3795_v59  ;;  %v1163_v16 = vmul.f32 %v3847_v11, %v3847_v11  ;;  %v613_v17 = vadd.f32 %v2198_v47, %v3797_v61 }
 0x168   :  { %v2202_v18 = vpop.eup %2201  ;;  %v802_v19 = vmul.f32 %v2200_v13, %v2200_v13  ;;  %v814_v20 = vmul.f32 %v2200_v13, %v3803_v55  ;;  %v3854_v21 = vpop.f32.mrb[10].mxu0  ;;  %v621_v23 = vmul.f32 %v2198_v47, %v3778_v33  ;;  %v812_v25 = vmul.f32 %v2200_v13, %v3784_v37 }
 0x169   :  { %v2204_v26 = vpop.eup %2203  ;;  %v615_v27 = vadd.f32 %v611_v60, %v3799_v62  ;;  %v617_v28 = vmul.f32 %v611_v60, %v599_v45  ;;  %v627_v59 = vadd.f32 %v623_v14, %v3801_v1  ;;  %v612_v29 = vmul.f32 %v2202_v18, %v2202_v18  ;;  %v3860_v31 = vpop.f32.mrb[10].mxu1 }
 0x16a   :  { %v3862_v61 = vpop.f32.mrb[11].mxu0  ;;  %v808_v49 = vmul.f32 %v802_v19, %v790_v50  ;;  %v624_v55 = vmul.f32 %v2202_v18, %v3805_v4  ;;  %v803_v32 = vmul.f32 %v2204_v26, %v2204_v26  ;;  %v815_v48 = vmul.f32 %v2204_v26, %v3812_v7  ;;  %v3866_v33 = vpop.f32.mrb[11].mxu1 }
 0x16b   :  { %v619_v37 = vadd.f32 %v617_v28, %v3814_v8  ;;  %v3869_v34 = vadd.f32 %v802_v19, %v615_v27  ;;  %v3871_v62 = vadd.f32 %v814_v20, %v627_v59  ;;  %v616_v1 = vadd.f32 %v612_v29, %v3816_v9 }
 0x16c   :  { %v618_v35 = vmul.f32 %v612_v29, %v606_v51  ;;  %v628_v38 = vadd.f32 %v624_v55, %v3820_v12  ;;  %v809_v39 = vmul.f32 %v803_v32, %v797_v57  ;;  %v973_v4 = vmul.f32 %v3854_v21, %v3854_v21 }
 0x16d   :  { %v3877_v40 = vadd.f32 %v808_v49, %v619_v37  ;;  %v3879_v7 = vadd.f32 %v803_v32, %v616_v1  ;;  %v1164_v8 = vmul.f32 %v3860_v31, %v3860_v31  ;;  %v974_v41 = vmul.f32 %v3862_v61, %v3862_v61 }
 0x16e   :  { %v620_v42 = vadd.f32 %v618_v35, %v3824_v15  ;;  %v3886_v9 = vadd.f32 %v815_v48, %v628_v38  ;;  %v975_v44 = vadd.f32 %v973_v4, %v971_v56  ;;  %v1165_v12 = vmul.f32 %v3866_v33, %v3866_v33 }
 0x16f   :  { %v1166_v45 = vadd.f32 %v1164_v8, %v1162_v10  ;;  %v982_v50 = vadd.f32 %v974_v41, %v972_v6  ;;  %v625_v46 = vadd.f32 %v621_v23, %v3830_v24  ;;  %v804_v51 = vadd.f32 %v2200_v13, %v613_v17 }
 0x170   :  { %v3891_v53 = vadd.f32 %v809_v39, %v620_v42  ;;  %v976_v54 = vrot.slane %v975_v44, 4  ;;  %v1173_v57 = vadd.f32 %v1165_v12, %v1163_v16  ;;  %v614_v58 = vadd.f32 %v2202_v18, %v3828_v22 }
 0x171   :  { %v1167_v52 = vrot.slane %v1166_v45, 4  ;;  %v983_v47 = vrot.slane %v982_v50, 4  ;;  %v3894_v15 = vadd.f32 %v812_v25, %v625_v46  ;;  %v622_v56 = vmul.f32 %v2202_v18, %v3782_v36 }
 0x172   :  { %v977_v60 = vadd.f32 %v976_v54, %v975_v44  ;;  %v1174_v14 = vrot.slane %v1173_v57, 4  ;;  %v3897_v19 = vadd.f32 %v2204_v26, %v614_v58  ;;  %v813_v6 = vmul.f32 %v2204_v26, %v3790_v43 }
 0x173   :  { %v1168_v24 = vadd.f32 %v1167_v52, %v1166_v45  ;;  %v984_v10 = vadd.f32 %v983_v47, %v982_v50  ;;  %v626_v13 = vadd.f32 %v622_v56, %v3833_v30 }
 0x174   :  { %v978_v17 = vrot.slane %v977_v60, 2  ;;  %v1175_v16 = vadd.f32 %v1174_v14, %v1173_v57 }
 0x175   :  { %v1169_v20 = vrot.slane %v1168_v24, 2  ;;  %v985_v22 = vrot.slane %v984_v10, 2  ;;  %v3901_v23 = vadd.f32 %v813_v6, %v626_v13 }
 0x176   :  { %v979_v25 = vadd.f32 %v978_v17, %v977_v60  ;;  %v1176_v27 = vrot.slane %v1175_v16, 2 }
 0x177   :  { %v1170_v28 = vadd.f32 %v1169_v20, %v1168_v24  ;;  %v986_v36 = vadd.f32 %v985_v22, %v984_v10 }
 0x178   :  { %v980_v18 = vrot.slane %v979_v25, 1  ;;  %v1177_v59 = vadd.f32 %v1176_v27, %v1175_v16 }
 0x179   :  { %v1171_v29 = vrot.slane %v1170_v28, 1  ;;  %v987_v49 = vrot.slane %v986_v36, 1 }
 0x17a   :  { %v981_v55 = vadd.f32 %v980_v18, %v979_v25  ;;  %v1178_v43 = vrot.slane %v1177_v59, 1 }
 0x17b   :  { %v1172_v26 = vadd.f32 %v1171_v29, %v1170_v28  ;;  %v988_v32 = vadd.f32 %v987_v49, %v986_v36 }
 0x17c   :  { %v989_v48 = vadd.f32 1.0, %v981_v55  ;;  %v1179_v30 = vadd.f32 %v1178_v43, %v1177_v59 }
 0x17d   :  { %v1180_v37 = vadd.f32 1.0, %v1172_v26  ;;  %v990_v1 = vadd.f32 1.0, %v988_v32 }
 0x17e   :  { %2205 = vrsqrt.f32 %v989_v48  ;;  %v1181_v35 = vadd.f32 1.0, %v1179_v30 }
 0x17f   :  { %2207 = vrsqrt.f32 %v1180_v37 }
 0x180   :  { %2209 = vrsqrt.f32 %v990_v1 }
 0x181   :  { %2211 = vrsqrt.f32 %v1181_v35 }
 0x184   :  { %v3903_v38 = vpop.f32.mrb[12].mxu0 }
 0x185   :  { %v3905_v39 = vpop.f32.mrb[13].mxu0  ;;  %v3907_v4 = vpop.f32.mrb[12].mxu1  ;;  %v1353_v42 = vmul.f32 %v3903_v38, %v3903_v38 }
 0x186   :  { %v3909_v8 = vpop.f32.mrb[13].mxu1  ;;  %v1354_v44 = vmul.f32 %v3905_v39, %v3905_v39  ;;  %v1544_v12 = vmul.f32 %v3907_v4, %v3907_v4 }
 0x187   :  { %v1545_v45 = vmul.f32 %v3909_v8, %v3909_v8 }
 0x188   :  { %v2206_v41 = vpop.eup %2205  ;;  %v3919_v50 = vpop.f32.mrb[14].mxu0 }
 0x189   :  { %v2208_v46 = vpop.eup %2207  ;;  %v993_v54 = vmul.f32 %v2206_v41, %v2206_v41  ;;  %v1005_v57 = vmul.f32 %v2206_v41, %v3854_v21  ;;  %v1355_v58 = vmul.f32 %v3919_v50, %v3919_v50  ;;  %v995_v52 = vadd.f32 %v2206_v41, %v804_v51  ;;  %v3924_v47 = vpop.f32.mrb[14].mxu1 }
 0x18a   :  { %v3926_v56 = vpop.f32.mrb[15].mxu0  ;;  %v2210_v60 = vpop.eup %2209  ;;  %v1184_v14 = vmul.f32 %v2208_v46, %v2208_v46  ;;  %v1196_v6 = vmul.f32 %v2208_v46, %v3860_v31  ;;  %v1003_v24 = vmul.f32 %v2206_v41, %v3835_v63  ;;  %v1194_v10 = vmul.f32 %v2208_v46, %v3839_v5 }
 0x18b   :  { %v3931_v13 = vpop.f32.mrb[15].mxu1  ;;  %v2212_v17 = vpop.eup %2211  ;;  %v997_v21 = vadd.f32 %v993_v54, %v3869_v34  ;;  %v999_v16 = vmul.f32 %v993_v54, %v981_v55  ;;  %v1009_v51 = vadd.f32 %v1005_v57, %v3871_v62  ;;  %v994_v20 = vmul.f32 %v2210_v60, %v2210_v60 }
 0x18c   :  { %v1190_v22 = vmul.f32 %v1184_v14, %v1172_v26  ;;  %v1006_v25 = vmul.f32 %v2210_v60, %v3862_v61  ;;  %v1185_v27 = vmul.f32 %v2212_v17, %v2212_v17  ;;  %v1197_v28 = vmul.f32 %v2212_v17, %v3866_v33 }
 0x18d   :  { %v1001_v31 = vadd.f32 %v999_v16, %v3877_v40  ;;  %v3938_v63 = vadd.f32 %v1184_v14, %v997_v21  ;;  %v3940_v5 = vadd.f32 %v1196_v6, %v1009_v51  ;;  %v998_v36 = vadd.f32 %v994_v20, %v3879_v7 }
 0x18e   :  { %v1000_v18 = vmul.f32 %v994_v20, %v988_v32  ;;  %v1010_v34 = vadd.f32 %v1006_v25, %v3886_v9  ;;  %v1191_v59 = vmul.f32 %v1185_v27, %v1179_v30  ;;  %v1357_v62 = vadd.f32 %v1355_v58, %v1353_v42 }
 0x18f   :  { %v3944_v29 = vadd.f32 %v1190_v22, %v1001_v31  ;;  %v3946_v49 = vadd.f32 %v1185_v27, %v998_v36  ;;  %v1007_v61 = vadd.f32 %v1003_v24, %v3894_v15  ;;  %v1186_v33 = vadd.f32 %v2208_v46, %v995_v52 }
 0x190   :  { %v1002_v40 = vadd.f32 %v1000_v18, %v3891_v53  ;;  %v3950_v55 = vadd.f32 %v1197_v28, %v1010_v34  ;;  %v1358_v43 = vrot.slane %v1357_v62, 4  ;;  %v1546_v7 = vmul.f32 %v3924_v47, %v3924_v47 }
 0x191   :  { %v1198_v26 = vadd.f32 %v1194_v10, %v1007_v61  ;;  %v1356_v9 = vmul.f32 %v3926_v56, %v3926_v56  ;;  %v996_v32 = vadd.f32 %v2210_v60, %v3897_v19  ;;  %v1004_v48 = vmul.f32 %v2210_v60, %v3837_v3 }
 0x192   :  { %v3958_v30 = vadd.f32 %v1191_v59, %v1002_v40  ;;  %v1359_v15 = vadd.f32 %v1358_v43, %v1357_v62  ;;  %v1548_v37 = vadd.f32 %v1546_v7, %v1544_v12  ;;  %v1195_v53 = vmul.f32 %v2212_v17, %v3847_v11 }
 0x193   :  { %v1364_v1 = vadd.f32 %v1356_v9, %v1354_v44  ;;  %v1008_v35 = vadd.f32 %v1004_v48, %v3901_v23  ;;  %v1187_v41 = vadd.f32 %v2212_v17, %v996_v32  ;;  %v1547_v42 = vmul.f32 %v3931_v13, %v3931_v13 }
 0x194   :  { %v1360_v46 = vrot.slane %v1359_v15, 2  ;;  %v1549_v54 = vrot.slane %v1548_v37, 4 }
 0x195   :  { %v1365_v57 = vrot.slane %v1364_v1, 4  ;;  %v3964_v58 = vadd.f32 %v1195_v53, %v1008_v35  ;;  %v1555_v19 = vadd.f32 %v1547_v42, %v1545_v45 }
 0x196   :  { %v1361_v3 = vadd.f32 %v1360_v46, %v1359_v15  ;;  %v1550_v52 = vadd.f32 %v1549_v54, %v1548_v37 }
 0x197   :  { %v1366_v60 = vadd.f32 %v1365_v57, %v1364_v1  ;;  %v1556_v14 = vrot.slane %v1555_v19, 4 }
 0x198   :  { %v1362_v12 = vrot.slane %v1361_v3, 1  ;;  %v1551_v6 = vrot.slane %v1550_v52, 2 }
 0x199   :  { %v1367_v11 = vrot.slane %v1366_v60, 2  ;;  %v1557_v44 = vadd.f32 %v1556_v14, %v1555_v19 }
 0x19a   :  { %v1363_v24 = vadd.f32 %v1362_v12, %v1361_v3  ;;  %v1552_v23 = vadd.f32 %v1551_v6, %v1550_v52 }
 0x19b   :  { %v1368_v10 = vadd.f32 %v1367_v11, %v1366_v60  ;;  %v1558_v17 = vrot.slane %v1557_v44, 2 }
 0x19c   :  { %v1371_v21 = vadd.f32 1.0, %v1363_v24  ;;  %v1553_v16 = vrot.slane %v1552_v23, 1 }
 0x19d   :  { %v1369_v51 = vrot.slane %v1368_v10, 1  ;;  %v1559_v20 = vadd.f32 %v1558_v17, %v1557_v44 }
 0x19e   :  { %2213 = vrsqrt.f32 %v1371_v21  ;;  %v1554_v22 = vadd.f32 %v1553_v16, %v1552_v23 }
 0x19f   :  { %v1370_v25 = vadd.f32 %v1369_v51, %v1368_v10  ;;  %v1560_v45 = vrot.slane %v1559_v20, 1 }
 0x1a0   :  { %v1562_v27 = vadd.f32 1.0, %v1554_v22 }
 0x1a1   :  { %v1372_v28 = vadd.f32 1.0, %v1370_v25  ;;  %v1561_v31 = vadd.f32 %v1560_v45, %v1559_v20 }
 0x1a2   :  { %2215 = vrsqrt.f32 %v1562_v27 }
 0x1a3   :  { %2217 = vrsqrt.f32 %v1372_v28  ;;  %v1563_v36 = vadd.f32 1.0, %v1561_v31 }
 0x1a5   :  { %2219 = vrsqrt.f32 %v1563_v36 }
 0x1a8   :  { %v2214_v18 = vpop.eup %2213 }
 0x1a9   :  { %v1375_v34 = vmul.f32 %v2214_v18, %v2214_v18  ;;  %v1387_v59 = vmul.f32 %v2214_v18, %v3919_v50  ;;  %v1377_v62 = vadd.f32 %v2214_v18, %v1186_v33  ;;  %v1385_v61 = vmul.f32 %v2214_v18, %v3903_v38 }
 0x1ab   :  { %v1379_v40 = vadd.f32 %v1375_v34, %v3938_v63  ;;  %v1381_v43 = vmul.f32 %v1375_v34, %v1363_v24  ;;  %v1391_v7 = vadd.f32 %v1387_v59, %v3940_v5  ;;  %v1389_v9 = vadd.f32 %v1385_v61, %v1198_v26 }
 0x1ac   :  { %v2216_v32 = vpop.eup %2215 }
 0x1ad   :  { %v2218_v48 = vpop.eup %2217  ;;  %v1383_v15 = vadd.f32 %v1381_v43, %v3944_v29  ;;  %v1566_v37 = vmul.f32 %v2216_v32, %v2216_v32  ;;  %v1568_v53 = vadd.f32 %v2216_v32, %v1377_v62  ;;  %v1576_v1 = vmul.f32 %v2216_v32, %v3907_v4 }
 0x1ae   :  { %v1578_v35 = vmul.f32 %v2216_v32, %v3924_v47  ;;  %v1376_v50 = vmul.f32 %v2218_v48, %v2218_v48  ;;  %v1388_v33 = vmul.f32 %v2218_v48, %v3926_v56  ;;  %v1378_v38 = vadd.f32 %v2218_v48, %v1187_v41 }
 0x1af   :  { %v2220_v42 = vpop.eup %2219  ;;  %v1570_v63 = vadd.f32 %v1566_v37, %v1379_v40  ;;  %v1572_v46 = vmul.f32 %v1566_v37, %v1554_v22  ;;  %v1580_v54 = vadd.f32 %v1576_v1, %v1389_v9  ;;  %v1602_v5 = vmul.f32 %v1568_v53, %v1568_v53 }
 0x1b0   :  { %v1582_v26 = vadd.f32 %v1578_v35, %v1391_v7  ;;  %v1380_v57 = vadd.f32 %v1376_v50, %v3946_v49  ;;  %v1382_v19 = vmul.f32 %v1376_v50, %v1370_v25  ;;  %v1392_v4 = vadd.f32 %v1388_v33, %v3950_v55 }
 0x1b1   :  { %v1574_v29 = vadd.f32 %v1572_v46, %v1383_v15  ;;  %v1584_v3 = vmul.f32 %v1580_v54, %v1580_v54  ;;  %v1604_v52 = vsub.f32 %v1602_v5, %v1570_v63  ;;  %v1386_v56 = vmul.f32 %v2218_v48, %v3905_v39 }
 0x1b2   :  { %v1586_v60 = vmul.f32 %v1582_v26, %v1582_v26  ;;  %v1384_v47 = vadd.f32 %v1382_v19, %v3958_v30  ;;  %v1567_v41 = vmul.f32 %v2220_v42, %v2220_v42  ;;  %v1569_v12 = vadd.f32 %v2220_v42, %v1378_v38 }
 0x1b3   :  { %v1606_v14 = vmul.f32 0.5, %v1604_v52  ;;  %v1577_v6 = vmul.f32 %v2220_v42, %v3909_v8  ;;  %v1579_v11 = vmul.f32 %v2220_v42, %v3931_v13  ;;  %v1390_v49 = vadd.f32 %v1386_v56, %v3964_v58 }
 0x1b4   :  { %v1588_v44 = vadd.f32 %v1586_v60, %v1584_v3  ;;  %v1571_v24 = vadd.f32 %v1567_v41, %v1380_v57  ;;  %v1573_v23 = vmul.f32 %v1567_v41, %v1561_v31  ;;  %v1610_v17 = vmul.f32 7.0, %v1568_v53 }
 0x1b5   :  { %v1608_v10 = vadd.f32 28.0, %v1606_v14  ;;  %v1583_v55 = vadd.f32 %v1579_v11, %v1392_v4  ;;  %v1603_v21 = vmul.f32 %v1569_v12, %v1569_v12  ;;  %v1581_v51 = vadd.f32 %v1577_v6, %v1390_v49 }
 0x1b6   :  { %v1589_v16 = vrot.slane %v1588_v44, 4  ;;  %v1575_v30 = vadd.f32 %v1573_v23, %v1384_v47  ;;  %v1611_v36 = vmul.f32 7.0, %v1569_v12  ;;  %v2307_v54 = vmov 1966171168  }
 0x1b7   :  { %v1612_v39 = vsub.f32 %v1608_v10, %v1610_v17  ;;  %v1587_v20 = vmul.f32 %v1583_v55, %v1583_v55  ;;  %v1605_v22 = vsub.f32 %v1603_v21, %v1571_v24  ;;  %v1585_v45 = vmul.f32 %v1581_v51, %v1581_v51 }
 0x1b8   :  { %v1590_v25 = vadd.f32 %v1589_v16, %v1588_v44  ;;  %v1634_v5 = vunpack.c.l.s4 %v2307_v54 }
 0x1b9   :  { %v1607_v8 = vmul.f32 0.5, %v1605_v22  ;;  %v1595_v13 = vadd.f32 %v1587_v20, %v1585_v45 }
 0x1ba   :  { %v1591_v27 = vrot.slane %v1590_v25, 2  ;;  %v1635_v26 = vunpack.c.0.s8 %v1634_v5 }
 0x1bb   :  { %v1609_v28 = vadd.f32 28.0, %v1607_v8  ;;  %v1596_v18 = vrot.slane %v1595_v13, 4 }
 0x1bc   :  { %v1592_v58 = vadd.f32 %v1591_v27, %v1590_v25  ;;  %v1638_v19 = vsub.s32 %v1635_v26, %v2358_v2 }
 0x1bd   :  { %v1613_v31 = vsub.f32 %v1609_v28, %v1611_v36  ;;  %v1597_v59 = vadd.f32 %v1596_v18, %v1595_v13 }
 0x1be   :  { %v1593_v34 = vrot.slane %v1592_v58, 1 }
 0x1bf   :  { %v1598_v61 = vrot.slane %v1597_v59, 2 }
 0x1c0   :  { %v1594_v62 = vadd.f32 %v1593_v34, %v1592_v58 }
 0x1c1   :  { %v1599_v43 = vadd.f32 %v1598_v61, %v1597_v59 }
 0x1c2   :  { %v1614_v40 = vsub.f32 %v1594_v62, %v1574_v29 }
 0x1c3   :  { %v1600_v9 = vrot.slane %v1599_v43, 1 }
 0x1c4   :  { %v1616_v7 = vmul.f32 0.5, %v1614_v40 }
 0x1c5   :  { %v1601_v48 = vadd.f32 %v1600_v9, %v1599_v43 }
 0x1c6   :  { %v1618_v32 = vsub.f32 %v1612_v39, %v1616_v7 }
 0x1c7   :  { %v1615_v37 = vsub.f32 %v1601_v48, %v1575_v30 }
 0x1c8   :  { %v1620_v15 = vsub.f32 0.0, %v1618_v32 }
 0x1c9   :  { %v1617_v1 = vmul.f32 0.5, %v1615_v37 }
 0x1ca   :  { %v1622_v53 = vmul.f32 1.442695, %v1620_v15 }
 0x1cb   :  { %v1619_v35 = vsub.f32 %v1613_v31, %v1617_v1 }
 0x1cc   :  { %2221 = vpow2.f32 %v1622_v53 }
 0x1cd   :  { %v1621_v50 = vsub.f32 0.0, %v1619_v35 }
 0x1cf   :  { %v1624_v33 = vmul.f32 1.442695, %v1621_v50 }
 0x1d1   :  { %2223 = vpow2.f32 %v1624_v33 }
 0x1d6   :  { %v2222_v38 = vpop.eup %2221 }
 0x1d7   :  { %v1626_v42 = vadd.f32 1.0, %v2222_v38 }
 0x1d9   :  { %2225 = vrcp.f32 %v1626_v42 }
 0x1db   :  { %v2224_v63 = vpop.eup %2223 }
 0x1dc   :  { %v1627_v46 = vadd.f32 1.0, %v2224_v63 }
 0x1de   :  { %2227 = vrcp.f32 %v1627_v46 }
 0x1e3   :  { %v2226_v57 = vpop.eup %2225 }
 0x1e8   :  { %v2228_v29 = vpop.eup %2227 }
 0x1e9   :  { %v1632_v3 = vcombine.low %v2226_v57, %v2228_v29 }
 0x1eb   :  { %v1639_v52 = vrot.slane %v1632_v3, %v1638_v19 }
 0x1ed   :  { %v1646_v4 = vrot.slane %v1639_v52, %v1638_v19 }
 0x1ef   :  { %1652 = vst.msk [vmem:[#allocation7] sm:$0x3] %vm1650_vm10, %v1646_v4 }
 0x1f0   :  { %2284 = shalt.err (!%p2281_p6)
}
 0x1f1   :  { %s2285_s10 = scalar_lea.hbm %s3997_s2, 32 }
 0x1f2   :  { %p2286_p7 = scmp.ne.s32.totalorder %s3997_s2, %s2285_s10  ;;  %p2289_p8 = scmp.lt.u32.totalorder %s2285_s10, %s3997_s2 }
 0x1f4   :  { %p2291_p9 = pnand %p2289_p8, %p2286_p7 }
 0x1f6   :  { %2294 = shalt.err (!%p2291_p9)
}
 0x1f7   :  { %1662 = dma.vmem_to_hbm [thread:$0]  %s1660_s6, 32, %s3997_s2, [#allocation4]  }
 0x1f8   :  { %2299 = dma.done.wait [#allocation4], 32  }
 0x1f9   :  { %2300 = vsyncadd [#allocation4], 4294967264 }
 0x1fa   :  { %1666 = vsyncpa [#allocation3], 1 }
 0x1fb   :  { %1667 = vsyncpa [#allocation6], 1 }
 0x1fc   :  { %1668 = vsyncpa [#allocation4], 1 }

</bundles_post_ra>
